<compile_context>
chip_gen: v7x
topology: tpu7x:2x2x1
jax: 0.10.0
libtpu: 0.0.40
codegen_flags: <defaults>
</compile_context>

<pallas_src>
import math
import functools

import jax
import jax.numpy as jnp
from jax.experimental import pallas as pl
from jax.experimental.pallas import tpu as pltpu


# ------------------------- in-kernel helpers -------------------------

def _layernorm(x, w, b, eps=1e-5):
    mu = jnp.mean(x, axis=-1, keepdims=True)
    var = jnp.mean((x - mu) ** 2, axis=-1, keepdims=True)
    return (x - mu) * jax.lax.rsqrt(var + eps) * w + b


def _gelu_tanh(x):
    c = math.sqrt(2.0 / math.pi)
    return 0.5 * x * (1.0 + jnp.tanh(c * (x + 0.044715 * x * x * x)))


# ------------------------- Pallas kernel -------------------------

def block_kernel(x_ref,
                 ln1_w_ref, ln1_b_ref,
                 w_qkv_ref, b_qkv_ref, w_ao_ref, b_ao_ref,
                 ln2_w_ref, ln2_b_ref,
                 w_fc_ref, b_fc_ref, w_mo_ref, b_mo_ref,
                 o_ref, *, n_head):
    x = x_ref[0]                      # (T, C) f32 for the current batch element
    T, C = x.shape
    D = C // n_head

    # ---- attention branch: y = c_proj(softmax(mask(q k^T)) v) ----
    # (1/sqrt(D) is already folded into the q projection weights host-side.)
    h = _layernorm(x, ln1_w_ref[0], ln1_b_ref[0])
    qkv = jnp.dot(h.astype(jnp.bfloat16), w_qkv_ref[...],
                  preferred_element_type=jnp.float32) + b_qkv_ref[0]   # (T, 3C)

    # causal mask (lower triangular), built with 2-D iota (TPU requirement)
    row = jax.lax.broadcasted_iota(jnp.int32, (T, T), 0)
    col = jax.lax.broadcasted_iota(jnp.int32, (T, T), 1)
    causal = col <= row

    # Accumulate the output projection per head; start from its bias.
    acc = jnp.broadcast_to(b_ao_ref[0], (T, C)).astype(jnp.float32)
    for hidx in range(n_head):        # static loop over heads (small n_head)
        qh = qkv[:, hidx * D:(hidx + 1) * D].astype(jnp.bfloat16)          # (T, D)
        kh = qkv[:, C + hidx * D:C + (hidx + 1) * D].astype(jnp.bfloat16)  # (T, D)
        vh = qkv[:, 2 * C + hidx * D:2 * C + (hidx + 1) * D].astype(jnp.bfloat16)
        # q @ k^T without materializing a transpose: contract the last dims.
        s = jax.lax.dot_general(qh, kh, (((1,), (1,)), ((), ())),
                                preferred_element_type=jnp.float32)     # (T, T)
        s = jnp.where(causal, s, -jnp.inf)
        m = jnp.max(s, axis=-1, keepdims=True)
        p = jnp.exp(s - m)
        att = p * pl.reciprocal(jnp.sum(p, axis=-1, keepdims=True), approx=True)
        yh = jnp.dot(att.astype(jnp.bfloat16), vh,
                     preferred_element_type=jnp.float32)                # (T, D)
        # fold this head directly into c_proj (no concat, no (T, C) temp)
        acc = acc + jnp.dot(yh.astype(jnp.bfloat16), w_ao_ref[hidx],
                            preferred_element_type=jnp.float32)         # (T, C)
    x = x + acc                                             # residual 1

    # ---- MLP branch: c_proj(gelu_tanh(c_fc(ln_2(x)))) ----
    h2 = _layernorm(x, ln2_w_ref[0], ln2_b_ref[0])
    ff = jnp.dot(h2.astype(jnp.bfloat16), w_fc_ref[...],
                 preferred_element_type=jnp.float32) + b_fc_ref[0]      # (T, 4C)
    ff = _gelu_tanh(ff)
    ff = jnp.dot(ff.astype(jnp.bfloat16), w_mo_ref[...],
                 preferred_element_type=jnp.float32) + b_mo_ref[0]      # (T, C)
    o_ref[0] = (x + ff).astype(o_ref.dtype)                 # residual 2


# ------------------------- wrapper -------------------------

def block_forward(x, params, n_head):
    B, T, C = x.shape
    D = C // n_head
    scale = 1.0 / math.sqrt(D)

    # Host-side weight prep (free; in practice cache these):
    #   - transpose to (in_features, out_features) so the kernel never does .T
    #   - fold the attention scale into the q projection
    #   - cast matmul weights to bf16 (f32 accumulation kept in-kernel)
    #   - reshape the attention output projection per head: (H, D, C)
    w_qkv_t = params["w_qkv"].T                      # (C, 3C)
    w_qkv_t = w_qkv_t.at[:, :C].multiply(scale)
    b_qkv = params["b_qkv"].at[:, :C].multiply(scale)
    w_qkv_t = w_qkv_t.astype(jnp.bfloat16)
    w_ao_h = params["w_ao"].T.reshape(n_head, D, C).astype(jnp.bfloat16)
    w_fc_t = params["w_fc"].T.astype(jnp.bfloat16)   # (C, 4C)
    w_mo_t = params["w_mo"].T.astype(jnp.bfloat16)   # (4C, C)

    param_list = [
        params["ln1_w"], params["ln1_b"],
        w_qkv_t, b_qkv, w_ao_h, params["b_ao"],
        params["ln2_w"], params["ln2_b"],
        w_fc_t, params["b_fc"], w_mo_t, params["b_mo"],
    ]

    # Explicit scoped-VMEM budget sized from the actual buffers (with headroom).
    bytes_w = sum(int(p.size) * p.dtype.itemsize for p in param_list)
    bytes_act = 4 * (6 * T * C + 3 * T * C + 2 * 4 * T * C + n_head * T * T)
    vmem_limit = int(min(64 * 2**20, max(16 * 2**20, 4 * (bytes_w + bytes_act))))

    def const_spec(p, single_buffer):
        nd = p.ndim
        kwargs = {}
        if single_buffer:
            # constant index map across the grid -> one buffer is enough
            kwargs["pipeline_mode"] = pl.Buffered(1)
        return pl.BlockSpec(p.shape, lambda b, _nd=nd: (0,) * _nd, **kwargs)

    def run(single_buffer_weights):
        in_specs = [pl.BlockSpec((1, T, C), lambda b: (b, 0, 0))]
        in_specs += [const_spec(p, single_buffer_weights) for p in param_list]
        out = pl.pallas_call(
            functools.partial(block_kernel, n_head=n_head),
            out_shape=jax.ShapeDtypeStruct((B, T, C), x.dtype),
            grid=(B,),
            in_specs=in_specs,
            out_specs=pl.BlockSpec((1, T, C), lambda b: (b, 0, 0)),
            compiler_params=pltpu.CompilerParams(
                dimension_semantics=("parallel",),
                vmem_limit_bytes=vmem_limit),
        )(x, *param_list)
        return jax.block_until_ready(out)

    try:
        return run(True)
    except Exception:
        # Fallback for environments where pipeline_mode=pl.Buffered(1) on a
        # top-level pallas_call BlockSpec is not supported.
        return run(False)


# ------------------------- pure-JAX reference (for validation) -------------------------

def block_reference(x, params, n_head):
    B, T, C = x.shape
    D = C // n_head

    def ln(v, w, b):
        mu = jnp.mean(v, -1, keepdims=True)
        var = jnp.mean((v - mu) ** 2, -1, keepdims=True)
        return (v - mu) / jnp.sqrt(var + 1e-5) * w[0] + b[0]

    h = ln(x, params["ln1_w"], params["ln1_b"])
    qkv = h @ params["w_qkv"].T + params["b_qkv"][0]
    q, k, v = jnp.split(qkv, 3, axis=-1)
    q = q.reshape(B, T, n_head, D).transpose(0, 2, 1, 3)
    k = k.reshape(B, T, n_head, D).transpose(0, 2, 1, 3)
    v = v.reshape(B, T, n_head, D).transpose(0, 2, 1, 3)
    att = jnp.einsum("bhtd,bhsd->bhts", q, k) / math.sqrt(D)
    mask = jnp.tril(jnp.ones((T, T), bool))
    att = jnp.where(mask, att, -jnp.inf)
    att = jax.nn.softmax(att, axis=-1)
    y = jnp.einsum("bhts,bhsd->bhtd", att, v)
    y = y.transpose(0, 2, 1, 3).reshape(B, T, C)
    y = y @ params["w_ao"].T + params["b_ao"][0]
    x = x + y
    h2 = ln(x, params["ln2_w"], params["ln2_b"])
    ff = h2 @ params["w_fc"].T + params["b_fc"][0]
    ff = 0.5 * ff * (1.0 + jnp.tanh(math.sqrt(2.0 / math.pi)
                                    * (ff + 0.044715 * ff ** 3)))
    ff = ff @ params["w_mo"].T + params["b_mo"][0]
    return x + ff


# ------------------------- main -------------------------

if __name__ == "__main__":
    B, T, C, n_head = 2, 8, 32, 4        # block_size == T == 8

    key = jax.random.PRNGKey(0)
    keys = jax.random.split(key, 9)

    params = {
        "ln1_w": jnp.ones((1, C), jnp.float32),
        "ln1_b": jnp.zeros((1, C), jnp.float32),
        "w_qkv": 0.02 * jax.random.normal(keys[0], (3 * C, C), jnp.float32),
        "b_qkv": 0.02 * jax.random.normal(keys[1], (1, 3 * C), jnp.float32),
        "w_ao":  0.02 * jax.random.normal(keys[2], (C, C), jnp.float32),
        "b_ao":  0.02 * jax.random.normal(keys[3], (1, C), jnp.float32),
        "ln2_w": jnp.ones((1, C), jnp.float32),
        "ln2_b": jnp.zeros((1, C), jnp.float32),
        "w_fc":  0.02 * jax.random.normal(keys[4], (4 * C, C), jnp.float32),
        "b_fc":  0.02 * jax.random.normal(keys[5], (1, 4 * C), jnp.float32),
        "w_mo":  0.02 * jax.random.normal(keys[6], (C, 4 * C), jnp.float32),
        "b_mo":  0.02 * jax.random.normal(keys[7], (1, C), jnp.float32),
    }

    x = jax.random.normal(keys[8], (B, T, C), jnp.float32)

    out = block_forward(x, params, n_head)
    out = jax.block_until_ready(out)

    ref = block_reference(x, params, n_head)
    err = float(jnp.max(jnp.abs(out - ref)))
    assert out.shape == (B, T, C)
    # bf16 matmul operands (f32 accumulation) -> loosened tolerance vs f32 ref
    assert jnp.allclose(out, ref, rtol=1e-2, atol=1e-2), f"max abs err {err}"

    print("KERNEL_OK")
</pallas_src>

<mosaic_0001>
module attributes {stable_mosaic.version = 11 : i64} {
  func.func @block_kernel(%arg0: i32, %arg1: memref<1x8x32xf32, #tpu.memory_space<vmem>>, %arg2: memref<1x32xf32, #tpu.memory_space<vmem>>, %arg3: memref<1x32xf32, #tpu.memory_space<vmem>>, %arg4: memref<32x96xbf16, #tpu.memory_space<vmem>>, %arg5: memref<1x96xf32, #tpu.memory_space<vmem>>, %arg6: memref<4x8x32xbf16, #tpu.memory_space<vmem>>, %arg7: memref<1x32xf32, #tpu.memory_space<vmem>>, %arg8: memref<1x32xf32, #tpu.memory_space<vmem>>, %arg9: memref<1x32xf32, #tpu.memory_space<vmem>>, %arg10: memref<32x128xbf16, #tpu.memory_space<vmem>>, %arg11: memref<1x128xf32, #tpu.memory_space<vmem>>, %arg12: memref<128x32xbf16, #tpu.memory_space<vmem>>, %arg13: memref<1x32xf32, #tpu.memory_space<vmem>>, %arg14: memref<1x8x32xf32, #tpu.memory_space<vmem>>) attributes {dimension_semantics = [#tpu.dimension_semantics<parallel>], iteration_bounds = array<i64: 2>, scalar_prefetch = 0 : i64, scratch_operands = 0 : i64, tpu.core_type = #tpu.core_type<tc>, window_params = [{transform_indices = @transform_0, window_bounds = array<i64: 1, 8, 32>}, {pipeline_mode = #tpu.pipeline_mode<synchronous>, transform_indices = @transform_1, window_bounds = array<i64: 1, 32>}, {pipeline_mode = #tpu.pipeline_mode<synchronous>, transform_indices = @transform_2, window_bounds = array<i64: 1, 32>}, {pipeline_mode = #tpu.pipeline_mode<synchronous>, transform_indices = @transform_3, window_bounds = array<i64: 32, 96>}, {pipeline_mode = #tpu.pipeline_mode<synchronous>, transform_indices = @transform_4, window_bounds = array<i64: 1, 96>}, {pipeline_mode = #tpu.pipeline_mode<synchronous>, transform_indices = @transform_5, window_bounds = array<i64: 4, 8, 32>}, {pipeline_mode = #tpu.pipeline_mode<synchronous>, transform_indices = @transform_6, window_bounds = array<i64: 1, 32>}, {pipeline_mode = #tpu.pipeline_mode<synchronous>, transform_indices = @transform_7, window_bounds = array<i64: 1, 32>}, {pipeline_mode = #tpu.pipeline_mode<synchronous>, transform_indices = @transform_8, window_bounds = array<i64: 1, 32>}, {pipeline_mode = #tpu.pipeline_mode<synchronous>, transform_indices = @transform_9, window_bounds = array<i64: 32, 128>}, {pipeline_mode = #tpu.pipeline_mode<synchronous>, transform_indices = @transform_10, window_bounds = array<i64: 1, 128>}, {pipeline_mode = #tpu.pipeline_mode<synchronous>, transform_indices = @transform_11, window_bounds = array<i64: 128, 32>}, {pipeline_mode = #tpu.pipeline_mode<synchronous>, transform_indices = @transform_12, window_bounds = array<i64: 1, 32>}, {transform_indices = @transform_13, window_bounds = array<i64: 1, 8, 32>}]} {
    %c0 = arith.constant 0 : index
    %c0_0 = arith.constant 0 : index
    %c0_1 = arith.constant 0 : index
    %0 = vector.load %arg1[%c0, %c0_0, %c0_1] : memref<1x8x32xf32, #tpu.memory_space<vmem>>, vector<1x8x32xf32>
    %1 = vector.shape_cast %0 : vector<1x8x32xf32> to vector<8x32xf32>
    %c0_2 = arith.constant 0 : index
    %c0_3 = arith.constant 0 : index
    %2 = vector.load %arg2[%c0_2, %c0_3] : memref<1x32xf32, #tpu.memory_space<vmem>>, vector<1x32xf32>
    %3 = vector.shape_cast %2 : vector<1x32xf32> to vector<32xf32>
    %c0_4 = arith.constant 0 : index
    %c0_5 = arith.constant 0 : index
    %4 = vector.load %arg3[%c0_4, %c0_5] : memref<1x32xf32, #tpu.memory_space<vmem>>, vector<1x32xf32>
    %5 = vector.shape_cast %4 : vector<1x32xf32> to vector<32xf32>
    %cst = arith.constant dense<0.000000e+00> : vector<8xf32>
    %6 = vector.multi_reduction <add>, %1, %cst [1] : vector<8x32xf32> to vector<8xf32>
    %7 = vector.shape_cast %6 : vector<8xf32> to vector<8x1xf32>
    %cst_6 = arith.constant 3.200000e+01 : f32
    %8 = vector.broadcast %cst_6 : f32 to vector<8x1xf32>
    %9 = arith.divf %7, %8 : vector<8x1xf32>
    %10 = vector.broadcast %9 : vector<8x1xf32> to vector<8x32xf32>
    %11 = arith.subf %1, %10 : vector<8x32xf32>
    %12 = arith.mulf %11, %11 : vector<8x32xf32>
    %cst_7 = arith.constant dense<0.000000e+00> : vector<8xf32>
    %13 = vector.multi_reduction <add>, %12, %cst_7 [1] : vector<8x32xf32> to vector<8xf32>
    %14 = vector.shape_cast %13 : vector<8xf32> to vector<8x1xf32>
    %cst_8 = arith.constant 3.200000e+01 : f32
    %15 = vector.broadcast %cst_8 : f32 to vector<8x1xf32>
    %16 = arith.divf %14, %15 : vector<8x1xf32>
    %17 = vector.broadcast %9 : vector<8x1xf32> to vector<8x32xf32>
    %18 = arith.subf %1, %17 : vector<8x32xf32>
    %cst_9 = arith.constant 9.99999974E-6 : f32
    %19 = vector.broadcast %cst_9 : f32 to vector<8x1xf32>
    %20 = arith.addf %16, %19 : vector<8x1xf32>
    %21 = math.rsqrt %20 : vector<8x1xf32>
    %22 = vector.broadcast %21 : vector<8x1xf32> to vector<8x32xf32>
    %23 = arith.mulf %18, %22 : vector<8x32xf32>
    %24 = vector.shape_cast %3 : vector<32xf32> to vector<1x32xf32>
    %25 = vector.broadcast %24 : vector<1x32xf32> to vector<8x32xf32>
    %26 = arith.mulf %23, %25 : vector<8x32xf32>
    %27 = vector.shape_cast %5 : vector<32xf32> to vector<1x32xf32>
    %28 = vector.broadcast %27 : vector<1x32xf32> to vector<8x32xf32>
    %29 = arith.addf %26, %28 : vector<8x32xf32>
    %30 = arith.truncf %29 : vector<8x32xf32> to vector<8x32xbf16>
    %c0_10 = arith.constant 0 : index
    %c0_11 = arith.constant 0 : index
    %31 = vector.load %arg4[%c0_10, %c0_11] : memref<32x96xbf16, #tpu.memory_space<vmem>>, vector<32x96xbf16>
    %cst_12 = arith.constant dense<0.000000e+00> : vector<8x96xf32>
    %32 = tpu.matmul %30, %31, %cst_12 {dimension_numbers = #tpu.dot_dimension_numbers<[1], [0], [0], [1], [0, 0, 1, 1], [], []>} : vector<8x32xbf16>, vector<32x96xbf16>, vector<8x96xf32> -> vector<8x96xf32>
    %c0_13 = arith.constant 0 : index
    %c0_14 = arith.constant 0 : index
    %33 = vector.load %arg5[%c0_13, %c0_14] : memref<1x96xf32, #tpu.memory_space<vmem>>, vector<1x96xf32>
    %34 = vector.shape_cast %33 : vector<1x96xf32> to vector<96xf32>
    %35 = vector.shape_cast %34 : vector<96xf32> to vector<1x96xf32>
    %36 = vector.broadcast %35 : vector<1x96xf32> to vector<8x96xf32>
    %37 = arith.addf %32, %36 : vector<8x96xf32>
    %38 = tpu.iota {dimensions = array<i32: 0>} : vector<8x8xi32>
    %39 = tpu.iota {dimensions = array<i32: 1>} : vector<8x8xi32>
    %40 = arith.cmpi sle, %39, %38 : vector<8x8xi32>
    %c0_15 = arith.constant 0 : index
    %c0_16 = arith.constant 0 : index
    %41 = vector.load %arg7[%c0_15, %c0_16] : memref<1x32xf32, #tpu.memory_space<vmem>>, vector<1x32xf32>
    %42 = vector.shape_cast %41 : vector<1x32xf32> to vector<32xf32>
    %43 = vector.shape_cast %42 : vector<32xf32> to vector<1x32xf32>
    %44 = vector.broadcast %43 : vector<1x32xf32> to vector<8x32xf32>
    %45 = vector.extract_strided_slice %37 {offsets = [0, 0], sizes = [8, 8], strides = [1, 1]} : vector<8x96xf32> to vector<8x8xf32>
    %46 = arith.truncf %45 : vector<8x8xf32> to vector<8x8xbf16>
    %47 = vector.extract_strided_slice %37 {offsets = [0, 32], sizes = [8, 8], strides = [1, 1]} : vector<8x96xf32> to vector<8x8xf32>
    %48 = arith.truncf %47 : vector<8x8xf32> to vector<8x8xbf16>
    %49 = vector.extract_strided_slice %37 {offsets = [0, 64], sizes = [8, 8], strides = [1, 1]} : vector<8x96xf32> to vector<8x8xf32>
    %50 = arith.truncf %49 : vector<8x8xf32> to vector<8x8xbf16>
    %cst_17 = arith.constant dense<0.000000e+00> : vector<8x8xf32>
    %51 = tpu.matmul %46, %48, %cst_17 {dimension_numbers = #tpu.dot_dimension_numbers<[1], [1], [0], [0], [0, 0, 1, 0], [], []>} : vector<8x8xbf16>, vector<8x8xbf16>, vector<8x8xf32> -> vector<8x8xf32>
    %cst_18 = arith.constant 0xFF800000 : f32
    %52 = vector.broadcast %cst_18 : f32 to vector<8x8xf32>
    %53 = arith.select %40, %51, %52 : vector<8x8xi1>, vector<8x8xf32>
    %cst_19 = arith.constant dense<0xFF800000> : vector<8xf32>
    %54 = vector.multi_reduction <maximumf>, %53, %cst_19 [1] : vector<8x8xf32> to vector<8xf32>
    %55 = vector.shape_cast %54 : vector<8xf32> to vector<8x1xf32>
    %56 = vector.broadcast %55 : vector<8x1xf32> to vector<8x8xf32>
    %57 = arith.subf %53, %56 : vector<8x8xf32>
    %58 = math.exp %57 : vector<8x8xf32>
    %cst_20 = arith.constant dense<0.000000e+00> : vector<8xf32>
    %59 = vector.multi_reduction <add>, %58, %cst_20 [1] : vector<8x8xf32> to vector<8xf32>
    %60 = vector.shape_cast %59 : vector<8xf32> to vector<8x1xf32>
    %61 = tpu.reciprocal %60 {approx = true} : vector<8x1xf32> -> vector<8x1xf32>
    %62 = vector.broadcast %61 : vector<8x1xf32> to vector<8x8xf32>
    %63 = arith.mulf %58, %62 : vector<8x8xf32>
    %64 = arith.truncf %63 : vector<8x8xf32> to vector<8x8xbf16>
    %cst_21 = arith.constant dense<0.000000e+00> : vector<8x8xf32>
    %65 = tpu.matmul %64, %50, %cst_21 {dimension_numbers = #tpu.dot_dimension_numbers<[1], [0], [0], [1], [0, 0, 1, 1], [], []>} : vector<8x8xbf16>, vector<8x8xbf16>, vector<8x8xf32> -> vector<8x8xf32>
    %66 = arith.truncf %65 : vector<8x8xf32> to vector<8x8xbf16>
    %c0_22 = arith.constant 0 : index
    %c0_23 = arith.constant 0 : index
    %c0_24 = arith.constant 0 : index
    %67 = vector.load %arg6[%c0_22, %c0_23, %c0_24] : memref<4x8x32xbf16, #tpu.memory_space<vmem>>, vector<1x8x32xbf16>
    %68 = vector.shape_cast %67 : vector<1x8x32xbf16> to vector<8x32xbf16>
    %cst_25 = arith.constant dense<0.000000e+00> : vector<8x32xf32>
    %69 = tpu.matmul %66, %68, %cst_25 {dimension_numbers = #tpu.dot_dimension_numbers<[1], [0], [0], [1], [0, 0, 1, 1], [], []>} : vector<8x8xbf16>, vector<8x32xbf16>, vector<8x32xf32> -> vector<8x32xf32>
    %70 = arith.addf %44, %69 : vector<8x32xf32>
    %71 = vector.extract_strided_slice %37 {offsets = [0, 8], sizes = [8, 8], strides = [1, 1]} : vector<8x96xf32> to vector<8x8xf32>
    %72 = arith.truncf %71 : vector<8x8xf32> to vector<8x8xbf16>
    %73 = vector.extract_strided_slice %37 {offsets = [0, 40], sizes = [8, 8], strides = [1, 1]} : vector<8x96xf32> to vector<8x8xf32>
    %74 = arith.truncf %73 : vector<8x8xf32> to vector<8x8xbf16>
    %75 = vector.extract_strided_slice %37 {offsets = [0, 72], sizes = [8, 8], strides = [1, 1]} : vector<8x96xf32> to vector<8x8xf32>
    %76 = arith.truncf %75 : vector<8x8xf32> to vector<8x8xbf16>
    %cst_26 = arith.constant dense<0.000000e+00> : vector<8x8xf32>
    %77 = tpu.matmul %72, %74, %cst_26 {dimension_numbers = #tpu.dot_dimension_numbers<[1], [1], [0], [0], [0, 0, 1, 0], [], []>} : vector<8x8xbf16>, vector<8x8xbf16>, vector<8x8xf32> -> vector<8x8xf32>
    %cst_27 = arith.constant 0xFF800000 : f32
    %78 = vector.broadcast %cst_27 : f32 to vector<8x8xf32>
    %79 = arith.select %40, %77, %78 : vector<8x8xi1>, vector<8x8xf32>
    %cst_28 = arith.constant dense<0xFF800000> : vector<8xf32>
    %80 = vector.multi_reduction <maximumf>, %79, %cst_28 [1] : vector<8x8xf32> to vector<8xf32>
    %81 = vector.shape_cast %80 : vector<8xf32> to vector<8x1xf32>
    %82 = vector.broadcast %81 : vector<8x1xf32> to vector<8x8xf32>
    %83 = arith.subf %79, %82 : vector<8x8xf32>
    %84 = math.exp %83 : vector<8x8xf32>
    %cst_29 = arith.constant dense<0.000000e+00> : vector<8xf32>
    %85 = vector.multi_reduction <add>, %84, %cst_29 [1] : vector<8x8xf32> to vector<8xf32>
    %86 = vector.shape_cast %85 : vector<8xf32> to vector<8x1xf32>
    %87 = tpu.reciprocal %86 {approx = true} : vector<8x1xf32> -> vector<8x1xf32>
    %88 = vector.broadcast %87 : vector<8x1xf32> to vector<8x8xf32>
    %89 = arith.mulf %84, %88 : vector<8x8xf32>
    %90 = arith.truncf %89 : vector<8x8xf32> to vector<8x8xbf16>
    %cst_30 = arith.constant dense<0.000000e+00> : vector<8x8xf32>
    %91 = tpu.matmul %90, %76, %cst_30 {dimension_numbers = #tpu.dot_dimension_numbers<[1], [0], [0], [1], [0, 0, 1, 1], [], []>} : vector<8x8xbf16>, vector<8x8xbf16>, vector<8x8xf32> -> vector<8x8xf32>
    %92 = arith.truncf %91 : vector<8x8xf32> to vector<8x8xbf16>
    %c1 = arith.constant 1 : index
    %c0_31 = arith.constant 0 : index
    %c0_32 = arith.constant 0 : index
    %93 = vector.load %arg6[%c1, %c0_31, %c0_32] : memref<4x8x32xbf16, #tpu.memory_space<vmem>>, vector<1x8x32xbf16>
    %94 = vector.shape_cast %93 : vector<1x8x32xbf16> to vector<8x32xbf16>
    %cst_33 = arith.constant dense<0.000000e+00> : vector<8x32xf32>
    %95 = tpu.matmul %92, %94, %cst_33 {dimension_numbers = #tpu.dot_dimension_numbers<[1], [0], [0], [1], [0, 0, 1, 1], [], []>} : vector<8x8xbf16>, vector<8x32xbf16>, vector<8x32xf32> -> vector<8x32xf32>
    %96 = arith.addf %70, %95 : vector<8x32xf32>
    %97 = vector.extract_strided_slice %37 {offsets = [0, 16], sizes = [8, 8], strides = [1, 1]} : vector<8x96xf32> to vector<8x8xf32>
    %98 = arith.truncf %97 : vector<8x8xf32> to vector<8x8xbf16>
    %99 = vector.extract_strided_slice %37 {offsets = [0, 48], sizes = [8, 8], strides = [1, 1]} : vector<8x96xf32> to vector<8x8xf32>
    %100 = arith.truncf %99 : vector<8x8xf32> to vector<8x8xbf16>
    %101 = vector.extract_strided_slice %37 {offsets = [0, 80], sizes = [8, 8], strides = [1, 1]} : vector<8x96xf32> to vector<8x8xf32>
    %102 = arith.truncf %101 : vector<8x8xf32> to vector<8x8xbf16>
    %cst_34 = arith.constant dense<0.000000e+00> : vector<8x8xf32>
    %103 = tpu.matmul %98, %100, %cst_34 {dimension_numbers = #tpu.dot_dimension_numbers<[1], [1], [0], [0], [0, 0, 1, 0], [], []>} : vector<8x8xbf16>, vector<8x8xbf16>, vector<8x8xf32> -> vector<8x8xf32>
    %cst_35 = arith.constant 0xFF800000 : f32
    %104 = vector.broadcast %cst_35 : f32 to vector<8x8xf32>
    %105 = arith.select %40, %103, %104 : vector<8x8xi1>, vector<8x8xf32>
    %cst_36 = arith.constant dense<0xFF800000> : vector<8xf32>
    %106 = vector.multi_reduction <maximumf>, %105, %cst_36 [1] : vector<8x8xf32> to vector<8xf32>
    %107 = vector.shape_cast %106 : vector<8xf32> to vector<8x1xf32>
    %108 = vector.broadcast %107 : vector<8x1xf32> to vector<8x8xf32>
    %109 = arith.subf %105, %108 : vector<8x8xf32>
    %110 = math.exp %109 : vector<8x8xf32>
    %cst_37 = arith.constant dense<0.000000e+00> : vector<8xf32>
    %111 = vector.multi_reduction <add>, %110, %cst_37 [1] : vector<8x8xf32> to vector<8xf32>
    %112 = vector.shape_cast %111 : vector<8xf32> to vector<8x1xf32>
    %113 = tpu.reciprocal %112 {approx = true} : vector<8x1xf32> -> vector<8x1xf32>
    %114 = vector.broadcast %113 : vector<8x1xf32> to vector<8x8xf32>
    %115 = arith.mulf %110, %114 : vector<8x8xf32>
    %116 = arith.truncf %115 : vector<8x8xf32> to vector<8x8xbf16>
    %cst_38 = arith.constant dense<0.000000e+00> : vector<8x8xf32>
    %117 = tpu.matmul %116, %102, %cst_38 {dimension_numbers = #tpu.dot_dimension_numbers<[1], [0], [0], [1], [0, 0, 1, 1], [], []>} : vector<8x8xbf16>, vector<8x8xbf16>, vector<8x8xf32> -> vector<8x8xf32>
    %118 = arith.truncf %117 : vector<8x8xf32> to vector<8x8xbf16>
    %c2 = arith.constant 2 : index
    %c0_39 = arith.constant 0 : index
    %c0_40 = arith.constant 0 : index
    %119 = vector.load %arg6[%c2, %c0_39, %c0_40] : memref<4x8x32xbf16, #tpu.memory_space<vmem>>, vector<1x8x32xbf16>
    %120 = vector.shape_cast %119 : vector<1x8x32xbf16> to vector<8x32xbf16>
    %cst_41 = arith.constant dense<0.000000e+00> : vector<8x32xf32>
    %121 = tpu.matmul %118, %120, %cst_41 {dimension_numbers = #tpu.dot_dimension_numbers<[1], [0], [0], [1], [0, 0, 1, 1], [], []>} : vector<8x8xbf16>, vector<8x32xbf16>, vector<8x32xf32> -> vector<8x32xf32>
    %122 = arith.addf %96, %121 : vector<8x32xf32>
    %123 = vector.extract_strided_slice %37 {offsets = [0, 24], sizes = [8, 8], strides = [1, 1]} : vector<8x96xf32> to vector<8x8xf32>
    %124 = arith.truncf %123 : vector<8x8xf32> to vector<8x8xbf16>
    %125 = vector.extract_strided_slice %37 {offsets = [0, 56], sizes = [8, 8], strides = [1, 1]} : vector<8x96xf32> to vector<8x8xf32>
    %126 = arith.truncf %125 : vector<8x8xf32> to vector<8x8xbf16>
    %127 = vector.extract_strided_slice %37 {offsets = [0, 88], sizes = [8, 8], strides = [1, 1]} : vector<8x96xf32> to vector<8x8xf32>
    %128 = arith.truncf %127 : vector<8x8xf32> to vector<8x8xbf16>
    %cst_42 = arith.constant dense<0.000000e+00> : vector<8x8xf32>
    %129 = tpu.matmul %124, %126, %cst_42 {dimension_numbers = #tpu.dot_dimension_numbers<[1], [1], [0], [0], [0, 0, 1, 0], [], []>} : vector<8x8xbf16>, vector<8x8xbf16>, vector<8x8xf32> -> vector<8x8xf32>
    %cst_43 = arith.constant 0xFF800000 : f32
    %130 = vector.broadcast %cst_43 : f32 to vector<8x8xf32>
    %131 = arith.select %40, %129, %130 : vector<8x8xi1>, vector<8x8xf32>
    %cst_44 = arith.constant dense<0xFF800000> : vector<8xf32>
    %132 = vector.multi_reduction <maximumf>, %131, %cst_44 [1] : vector<8x8xf32> to vector<8xf32>
    %133 = vector.shape_cast %132 : vector<8xf32> to vector<8x1xf32>
    %134 = vector.broadcast %133 : vector<8x1xf32> to vector<8x8xf32>
    %135 = arith.subf %131, %134 : vector<8x8xf32>
    %136 = math.exp %135 : vector<8x8xf32>
    %cst_45 = arith.constant dense<0.000000e+00> : vector<8xf32>
    %137 = vector.multi_reduction <add>, %136, %cst_45 [1] : vector<8x8xf32> to vector<8xf32>
    %138 = vector.shape_cast %137 : vector<8xf32> to vector<8x1xf32>
    %139 = tpu.reciprocal %138 {approx = true} : vector<8x1xf32> -> vector<8x1xf32>
    %140 = vector.broadcast %139 : vector<8x1xf32> to vector<8x8xf32>
    %141 = arith.mulf %136, %140 : vector<8x8xf32>
    %142 = arith.truncf %141 : vector<8x8xf32> to vector<8x8xbf16>
    %cst_46 = arith.constant dense<0.000000e+00> : vector<8x8xf32>
    %143 = tpu.matmul %142, %128, %cst_46 {dimension_numbers = #tpu.dot_dimension_numbers<[1], [0], [0], [1], [0, 0, 1, 1], [], []>} : vector<8x8xbf16>, vector<8x8xbf16>, vector<8x8xf32> -> vector<8x8xf32>
    %144 = arith.truncf %143 : vector<8x8xf32> to vector<8x8xbf16>
    %c3 = arith.constant 3 : index
    %c0_47 = arith.constant 0 : index
    %c0_48 = arith.constant 0 : index
    %145 = vector.load %arg6[%c3, %c0_47, %c0_48] : memref<4x8x32xbf16, #tpu.memory_space<vmem>>, vector<1x8x32xbf16>
    %146 = vector.shape_cast %145 : vector<1x8x32xbf16> to vector<8x32xbf16>
    %cst_49 = arith.constant dense<0.000000e+00> : vector<8x32xf32>
    %147 = tpu.matmul %144, %146, %cst_49 {dimension_numbers = #tpu.dot_dimension_numbers<[1], [0], [0], [1], [0, 0, 1, 1], [], []>} : vector<8x8xbf16>, vector<8x32xbf16>, vector<8x32xf32> -> vector<8x32xf32>
    %148 = arith.addf %122, %147 : vector<8x32xf32>
    %149 = arith.addf %1, %148 : vector<8x32xf32>
    %c0_50 = arith.constant 0 : index
    %c0_51 = arith.constant 0 : index
    %150 = vector.load %arg8[%c0_50, %c0_51] : memref<1x32xf32, #tpu.memory_space<vmem>>, vector<1x32xf32>
    %151 = vector.shape_cast %150 : vector<1x32xf32> to vector<32xf32>
    %c0_52 = arith.constant 0 : index
    %c0_53 = arith.constant 0 : index
    %152 = vector.load %arg9[%c0_52, %c0_53] : memref<1x32xf32, #tpu.memory_space<vmem>>, vector<1x32xf32>
    %153 = vector.shape_cast %152 : vector<1x32xf32> to vector<32xf32>
    %cst_54 = arith.constant dense<0.000000e+00> : vector<8xf32>
    %154 = vector.multi_reduction <add>, %149, %cst_54 [1] : vector<8x32xf32> to vector<8xf32>
    %155 = vector.shape_cast %154 : vector<8xf32> to vector<8x1xf32>
    %cst_55 = arith.constant 3.200000e+01 : f32
    %156 = vector.broadcast %cst_55 : f32 to vector<8x1xf32>
    %157 = arith.divf %155, %156 : vector<8x1xf32>
    %158 = vector.broadcast %157 : vector<8x1xf32> to vector<8x32xf32>
    %159 = arith.subf %149, %158 : vector<8x32xf32>
    %160 = arith.mulf %159, %159 : vector<8x32xf32>
    %cst_56 = arith.constant dense<0.000000e+00> : vector<8xf32>
    %161 = vector.multi_reduction <add>, %160, %cst_56 [1] : vector<8x32xf32> to vector<8xf32>
    %162 = vector.shape_cast %161 : vector<8xf32> to vector<8x1xf32>
    %cst_57 = arith.constant 3.200000e+01 : f32
    %163 = vector.broadcast %cst_57 : f32 to vector<8x1xf32>
    %164 = arith.divf %162, %163 : vector<8x1xf32>
    %165 = vector.broadcast %157 : vector<8x1xf32> to vector<8x32xf32>
    %166 = arith.subf %149, %165 : vector<8x32xf32>
    %cst_58 = arith.constant 9.99999974E-6 : f32
    %167 = vector.broadcast %cst_58 : f32 to vector<8x1xf32>
    %168 = arith.addf %164, %167 : vector<8x1xf32>
    %169 = math.rsqrt %168 : vector<8x1xf32>
    %170 = vector.broadcast %169 : vector<8x1xf32> to vector<8x32xf32>
    %171 = arith.mulf %166, %170 : vector<8x32xf32>
    %172 = vector.shape_cast %151 : vector<32xf32> to vector<1x32xf32>
    %173 = vector.broadcast %172 : vector<1x32xf32> to vector<8x32xf32>
    %174 = arith.mulf %171, %173 : vector<8x32xf32>
    %175 = vector.shape_cast %153 : vector<32xf32> to vector<1x32xf32>
    %176 = vector.broadcast %175 : vector<1x32xf32> to vector<8x32xf32>
    %177 = arith.addf %174, %176 : vector<8x32xf32>
    %178 = arith.truncf %177 : vector<8x32xf32> to vector<8x32xbf16>
    %c0_59 = arith.constant 0 : index
    %c0_60 = arith.constant 0 : index
    %179 = vector.load %arg10[%c0_59, %c0_60] : memref<32x128xbf16, #tpu.memory_space<vmem>>, vector<32x128xbf16>
    %cst_61 = arith.constant dense<0.000000e+00> : vector<8x128xf32>
    %180 = tpu.matmul %178, %179, %cst_61 {dimension_numbers = #tpu.dot_dimension_numbers<[1], [0], [0], [1], [0, 0, 1, 1], [], []>} : vector<8x32xbf16>, vector<32x128xbf16>, vector<8x128xf32> -> vector<8x128xf32>
    %c0_62 = arith.constant 0 : index
    %c0_63 = arith.constant 0 : index
    %181 = vector.load %arg11[%c0_62, %c0_63] : memref<1x128xf32, #tpu.memory_space<vmem>>, vector<1x128xf32>
    %182 = vector.shape_cast %181 : vector<1x128xf32> to vector<128xf32>
    %183 = vector.shape_cast %182 : vector<128xf32> to vector<1x128xf32>
    %184 = vector.broadcast %183 : vector<1x128xf32> to vector<8x128xf32>
    %185 = arith.addf %180, %184 : vector<8x128xf32>
    %cst_64 = arith.constant 5.000000e-01 : f32
    %186 = vector.broadcast %cst_64 : f32 to vector<8x128xf32>
    %187 = arith.mulf %186, %185 : vector<8x128xf32>
    %cst_65 = arith.constant 4.471500e-02 : f32
    %188 = vector.broadcast %cst_65 : f32 to vector<8x128xf32>
    %189 = arith.mulf %188, %185 : vector<8x128xf32>
    %190 = arith.mulf %189, %185 : vector<8x128xf32>
    %191 = arith.mulf %190, %185 : vector<8x128xf32>
    %192 = arith.addf %185, %191 : vector<8x128xf32>
    %cst_66 = arith.constant 0.797884583 : f32
    %193 = vector.broadcast %cst_66 : f32 to vector<8x128xf32>
    %194 = arith.mulf %193, %192 : vector<8x128xf32>
    %195 = math.tanh %194 : vector<8x128xf32>
    %cst_67 = arith.constant 1.000000e+00 : f32
    %196 = vector.broadcast %cst_67 : f32 to vector<8x128xf32>
    %197 = arith.addf %196, %195 : vector<8x128xf32>
    %198 = arith.mulf %187, %197 : vector<8x128xf32>
    %199 = arith.truncf %198 : vector<8x128xf32> to vector<8x128xbf16>
    %c0_68 = arith.constant 0 : index
    %c0_69 = arith.constant 0 : index
    %200 = vector.load %arg12[%c0_68, %c0_69] : memref<128x32xbf16, #tpu.memory_space<vmem>>, vector<128x32xbf16>
    %cst_70 = arith.constant dense<0.000000e+00> : vector<8x32xf32>
    %201 = tpu.matmul %199, %200, %cst_70 {dimension_numbers = #tpu.dot_dimension_numbers<[1], [0], [0], [1], [0, 0, 1, 1], [], []>} : vector<8x128xbf16>, vector<128x32xbf16>, vector<8x32xf32> -> vector<8x32xf32>
    %c0_71 = arith.constant 0 : index
    %c0_72 = arith.constant 0 : index
    %202 = vector.load %arg13[%c0_71, %c0_72] : memref<1x32xf32, #tpu.memory_space<vmem>>, vector<1x32xf32>
    %203 = vector.shape_cast %202 : vector<1x32xf32> to vector<32xf32>
    %204 = vector.shape_cast %203 : vector<32xf32> to vector<1x32xf32>
    %205 = vector.broadcast %204 : vector<1x32xf32> to vector<8x32xf32>
    %206 = arith.addf %201, %205 : vector<8x32xf32>
    %207 = arith.addf %149, %206 : vector<8x32xf32>
    %c0_73 = arith.constant 0 : index
    %c0_74 = arith.constant 0 : index
    %c0_75 = arith.constant 0 : index
    %208 = vector.load %arg14[%c0_73, %c0_74, %c0_75] : memref<1x8x32xf32, #tpu.memory_space<vmem>>, vector<1x8x32xf32>
    %209 = vector.shape_cast %208 : vector<1x8x32xf32> to vector<8x32xf32>
    %210 = vector.shape_cast %207 : vector<8x32xf32> to vector<1x8x32xf32>
    tpu.vector_store %arg14[%c0_73, %c0_74, %c0_75], %210 {strides = array<i32>} : memref<1x8x32xf32, #tpu.memory_space<vmem>>, vector<1x8x32xf32>,
    return
  }
  func.func @transform_0(%arg0: i32) -> (i32, i32, i32) {
    %c0_i32 = arith.constant 0 : i32
    %c0_i32_0 = arith.constant 0 : i32
    %c0_i32_1 = arith.constant 0 : i32
    return %arg0, %c0_i32, %c0_i32_0 : i32, i32, i32
  }
  func.func @transform_1(%arg0: i32) -> (i32, i32) {
    %c0_i32 = arith.constant 0 : i32
    %c0_i32_0 = arith.constant 0 : i32
    %c0_i32_1 = arith.constant 0 : i32
    return %c0_i32, %c0_i32_0 : i32, i32
  }
  func.func @transform_2(%arg0: i32) -> (i32, i32) {
    %c0_i32 = arith.constant 0 : i32
    %c0_i32_0 = arith.constant 0 : i32
    %c0_i32_1 = arith.constant 0 : i32
    return %c0_i32, %c0_i32_0 : i32, i32
  }
  func.func @transform_3(%arg0: i32) -> (i32, i32) {
    %c0_i32 = arith.constant 0 : i32
    %c0_i32_0 = arith.constant 0 : i32
    %c0_i32_1 = arith.constant 0 : i32
    return %c0_i32, %c0_i32_0 : i32, i32
  }
  func.func @transform_4(%arg0: i32) -> (i32, i32) {
    %c0_i32 = arith.constant 0 : i32
    %c0_i32_0 = arith.constant 0 : i32
    %c0_i32_1 = arith.constant 0 : i32
    return %c0_i32, %c0_i32_0 : i32, i32
  }
  func.func @transform_5(%arg0: i32) -> (i32, i32, i32) {
    %c0_i32 = arith.constant 0 : i32
    %c0_i32_0 = arith.constant 0 : i32
    %c0_i32_1 = arith.constant 0 : i32
    %c0_i32_2 = arith.constant 0 : i32
    return %c0_i32, %c0_i32_0, %c0_i32_1 : i32, i32, i32
  }
  func.func @transform_6(%arg0: i32) -> (i32, i32) {
    %c0_i32 = arith.constant 0 : i32
    %c0_i32_0 = arith.constant 0 : i32
    %c0_i32_1 = arith.constant 0 : i32
    return %c0_i32, %c0_i32_0 : i32, i32
  }
  func.func @transform_7(%arg0: i32) -> (i32, i32) {
    %c0_i32 = arith.constant 0 : i32
    %c0_i32_0 = arith.constant 0 : i32
    %c0_i32_1 = arith.constant 0 : i32
    return %c0_i32, %c0_i32_0 : i32, i32
  }
  func.func @transform_8(%arg0: i32) -> (i32, i32) {
    %c0_i32 = arith.constant 0 : i32
    %c0_i32_0 = arith.constant 0 : i32
    %c0_i32_1 = arith.constant 0 : i32
    return %c0_i32, %c0_i32_0 : i32, i32
  }
  func.func @transform_9(%arg0: i32) -> (i32, i32) {
    %c0_i32 = arith.constant 0 : i32
    %c0_i32_0 = arith.constant 0 : i32
    %c0_i32_1 = arith.constant 0 : i32
    return %c0_i32, %c0_i32_0 : i32, i32
  }
  func.func @transform_10(%arg0: i32) -> (i32, i32) {
    %c0_i32 = arith.constant 0 : i32
    %c0_i32_0 = arith.constant 0 : i32
    %c0_i32_1 = arith.constant 0 : i32
    return %c0_i32, %c0_i32_0 : i32, i32
  }
  func.func @transform_11(%arg0: i32) -> (i32, i32) {
    %c0_i32 = arith.constant 0 : i32
    %c0_i32_0 = arith.constant 0 : i32
    %c0_i32_1 = arith.constant 0 : i32
    return %c0_i32, %c0_i32_0 : i32, i32
  }
  func.func @transform_12(%arg0: i32) -> (i32, i32) {
    %c0_i32 = arith.constant 0 : i32
    %c0_i32_0 = arith.constant 0 : i32
    %c0_i32_1 = arith.constant 0 : i32
    return %c0_i32, %c0_i32_0 : i32, i32
  }
  func.func @transform_13(%arg0: i32) -> (i32, i32, i32) {
    %c0_i32 = arith.constant 0 : i32
    %c0_i32_0 = arith.constant 0 : i32
    %c0_i32_1 = arith.constant 0 : i32
    return %arg0, %c0_i32, %c0_i32_0 : i32, i32, i32
  }
}

module attributes {stable_mosaic.version = 11 : i64} {
  func.func @block_kernel(%arg0: i32, %arg1: memref<1x8x32xf32, #tpu.memory_space<vmem>>, %arg2: memref<1x32xf32, #tpu.memory_space<vmem>>, %arg3: memref<1x32xf32, #tpu.memory_space<vmem>>, %arg4: memref<32x96xbf16, #tpu.memory_space<vmem>>, %arg5: memref<1x96xf32, #tpu.memory_space<vmem>>, %arg6: memref<4x8x32xbf16, #tpu.memory_space<vmem>>, %arg7: memref<1x32xf32, #tpu.memory_space<vmem>>, %arg8: memref<1x32xf32, #tpu.memory_space<vmem>>, %arg9: memref<1x32xf32, #tpu.memory_space<vmem>>, %arg10: memref<32x128xbf16, #tpu.memory_space<vmem>>, %arg11: memref<1x128xf32, #tpu.memory_space<vmem>>, %arg12: memref<128x32xbf16, #tpu.memory_space<vmem>>, %arg13: memref<1x32xf32, #tpu.memory_space<vmem>>, %arg14: memref<1x8x32xf32, #tpu.memory_space<vmem>>) attributes {dimension_semantics = [#tpu.dimension_semantics<parallel>], iteration_bounds = array<i64: 2>, scalar_prefetch = 0 : i64, scratch_operands = 0 : i64, tpu.core_type = #tpu.core_type<tc>, window_params = [{transform_indices = @transform_0, window_bounds = array<i64: 1, 8, 32>}, {pipeline_mode = #tpu.pipeline_mode<synchronous>, transform_indices = @transform_1, window_bounds = array<i64: 1, 32>}, {pipeline_mode = #tpu.pipeline_mode<synchronous>, transform_indices = @transform_2, window_bounds = array<i64: 1, 32>}, {pipeline_mode = #tpu.pipeline_mode<synchronous>, transform_indices = @transform_3, window_bounds = array<i64: 32, 96>}, {pipeline_mode = #tpu.pipeline_mode<synchronous>, transform_indices = @transform_4, window_bounds = array<i64: 1, 96>}, {pipeline_mode = #tpu.pipeline_mode<synchronous>, transform_indices = @transform_5, window_bounds = array<i64: 4, 8, 32>}, {pipeline_mode = #tpu.pipeline_mode<synchronous>, transform_indices = @transform_6, window_bounds = array<i64: 1, 32>}, {pipeline_mode = #tpu.pipeline_mode<synchronous>, transform_indices = @transform_7, window_bounds = array<i64: 1, 32>}, {pipeline_mode = #tpu.pipeline_mode<synchronous>, transform_indices = @transform_8, window_bounds = array<i64: 1, 32>}, {pipeline_mode = #tpu.pipeline_mode<synchronous>, transform_indices = @transform_9, window_bounds = array<i64: 32, 128>}, {pipeline_mode = #tpu.pipeline_mode<synchronous>, transform_indices = @transform_10, window_bounds = array<i64: 1, 128>}, {pipeline_mode = #tpu.pipeline_mode<synchronous>, transform_indices = @transform_11, window_bounds = array<i64: 128, 32>}, {pipeline_mode = #tpu.pipeline_mode<synchronous>, transform_indices = @transform_12, window_bounds = array<i64: 1, 32>}, {transform_indices = @transform_13, window_bounds = array<i64: 1, 8, 32>}]} {
    %c0 = arith.constant 0 : index
    %c0_0 = arith.constant 0 : index
    %c0_1 = arith.constant 0 : index
    %0 = vector.load %arg1[%c0, %c0_0, %c0_1] : memref<1x8x32xf32, #tpu.memory_space<vmem>>, vector<1x8x32xf32>
    %1 = vector.shape_cast %0 : vector<1x8x32xf32> to vector<8x32xf32>
    %c0_2 = arith.constant 0 : index
    %c0_3 = arith.constant 0 : index
    %2 = vector.load %arg2[%c0_2, %c0_3] : memref<1x32xf32, #tpu.memory_space<vmem>>, vector<1x32xf32>
    %3 = vector.shape_cast %2 : vector<1x32xf32> to vector<32xf32>
    %c0_4 = arith.constant 0 : index
    %c0_5 = arith.constant 0 : index
    %4 = vector.load %arg3[%c0_4, %c0_5] : memref<1x32xf32, #tpu.memory_space<vmem>>, vector<1x32xf32>
    %5 = vector.shape_cast %4 : vector<1x32xf32> to vector<32xf32>
    %cst = arith.constant dense<0.000000e+00> : vector<8xf32>
    %6 = vector.multi_reduction <add>, %1, %cst [1] : vector<8x32xf32> to vector<8xf32>
    %7 = vector.shape_cast %6 : vector<8xf32> to vector<8x1xf32>
    %cst_6 = arith.constant 3.200000e+01 : f32
    %8 = vector.broadcast %cst_6 : f32 to vector<8x1xf32>
    %9 = arith.divf %7, %8 : vector<8x1xf32>
    %10 = vector.broadcast %9 : vector<8x1xf32> to vector<8x32xf32>
    %11 = arith.subf %1, %10 : vector<8x32xf32>
    %12 = arith.mulf %11, %11 : vector<8x32xf32>
    %cst_7 = arith.constant dense<0.000000e+00> : vector<8xf32>
    %13 = vector.multi_reduction <add>, %12, %cst_7 [1] : vector<8x32xf32> to vector<8xf32>
    %14 = vector.shape_cast %13 : vector<8xf32> to vector<8x1xf32>
    %cst_8 = arith.constant 3.200000e+01 : f32
    %15 = vector.broadcast %cst_8 : f32 to vector<8x1xf32>
    %16 = arith.divf %14, %15 : vector<8x1xf32>
    %17 = vector.broadcast %9 : vector<8x1xf32> to vector<8x32xf32>
    %18 = arith.subf %1, %17 : vector<8x32xf32>
    %cst_9 = arith.constant 9.99999974E-6 : f32
    %19 = vector.broadcast %cst_9 : f32 to vector<8x1xf32>
    %20 = arith.addf %16, %19 : vector<8x1xf32>
    %21 = math.rsqrt %20 : vector<8x1xf32>
    %22 = vector.broadcast %21 : vector<8x1xf32> to vector<8x32xf32>
    %23 = arith.mulf %18, %22 : vector<8x32xf32>
    %24 = vector.shape_cast %3 : vector<32xf32> to vector<1x32xf32>
    %25 = vector.broadcast %24 : vector<1x32xf32> to vector<8x32xf32>
    %26 = arith.mulf %23, %25 : vector<8x32xf32>
    %27 = vector.shape_cast %5 : vector<32xf32> to vector<1x32xf32>
    %28 = vector.broadcast %27 : vector<1x32xf32> to vector<8x32xf32>
    %29 = arith.addf %26, %28 : vector<8x32xf32>
    %30 = arith.truncf %29 : vector<8x32xf32> to vector<8x32xbf16>
    %c0_10 = arith.constant 0 : index
    %c0_11 = arith.constant 0 : index
    %31 = vector.load %arg4[%c0_10, %c0_11] : memref<32x96xbf16, #tpu.memory_space<vmem>>, vector<32x96xbf16>
    %cst_12 = arith.constant dense<0.000000e+00> : vector<8x96xf32>
    %32 = tpu.matmul %30, %31, %cst_12 {dimension_numbers = #tpu.dot_dimension_numbers<[1], [0], [0], [1], [0, 0, 1, 1], [], []>} : vector<8x32xbf16>, vector<32x96xbf16>, vector<8x96xf32> -> vector<8x96xf32>
    %c0_13 = arith.constant 0 : index
    %c0_14 = arith.constant 0 : index
    %33 = vector.load %arg5[%c0_13, %c0_14] : memref<1x96xf32, #tpu.memory_space<vmem>>, vector<1x96xf32>
    %34 = vector.shape_cast %33 : vector<1x96xf32> to vector<96xf32>
    %35 = vector.shape_cast %34 : vector<96xf32> to vector<1x96xf32>
    %36 = vector.broadcast %35 : vector<1x96xf32> to vector<8x96xf32>
    %37 = arith.addf %32, %36 : vector<8x96xf32>
    %38 = tpu.iota {dimensions = array<i32: 0>} : vector<8x8xi32>
    %39 = tpu.iota {dimensions = array<i32: 1>} : vector<8x8xi32>
    %40 = arith.cmpi sle, %39, %38 : vector<8x8xi32>
    %c0_15 = arith.constant 0 : index
    %c0_16 = arith.constant 0 : index
    %41 = vector.load %arg7[%c0_15, %c0_16] : memref<1x32xf32, #tpu.memory_space<vmem>>, vector<1x32xf32>
    %42 = vector.shape_cast %41 : vector<1x32xf32> to vector<32xf32>
    %43 = vector.shape_cast %42 : vector<32xf32> to vector<1x32xf32>
    %44 = vector.broadcast %43 : vector<1x32xf32> to vector<8x32xf32>
    %45 = vector.extract_strided_slice %37 {offsets = [0, 0], sizes = [8, 8], strides = [1, 1]} : vector<8x96xf32> to vector<8x8xf32>
    %46 = arith.truncf %45 : vector<8x8xf32> to vector<8x8xbf16>
    %47 = vector.extract_strided_slice %37 {offsets = [0, 32], sizes = [8, 8], strides = [1, 1]} : vector<8x96xf32> to vector<8x8xf32>
    %48 = arith.truncf %47 : vector<8x8xf32> to vector<8x8xbf16>
    %49 = vector.extract_strided_slice %37 {offsets = [0, 64], sizes = [8, 8], strides = [1, 1]} : vector<8x96xf32> to vector<8x8xf32>
    %50 = arith.truncf %49 : vector<8x8xf32> to vector<8x8xbf16>
    %cst_17 = arith.constant dense<0.000000e+00> : vector<8x8xf32>
    %51 = tpu.matmul %46, %48, %cst_17 {dimension_numbers = #tpu.dot_dimension_numbers<[1], [1], [0], [0], [0, 0, 1, 0], [], []>} : vector<8x8xbf16>, vector<8x8xbf16>, vector<8x8xf32> -> vector<8x8xf32>
    %cst_18 = arith.constant 0xFF800000 : f32
    %52 = vector.broadcast %cst_18 : f32 to vector<8x8xf32>
    %53 = arith.select %40, %51, %52 : vector<8x8xi1>, vector<8x8xf32>
    %cst_19 = arith.constant dense<0xFF800000> : vector<8xf32>
    %54 = vector.multi_reduction <maximumf>, %53, %cst_19 [1] : vector<8x8xf32> to vector<8xf32>
    %55 = vector.shape_cast %54 : vector<8xf32> to vector<8x1xf32>
    %56 = vector.broadcast %55 : vector<8x1xf32> to vector<8x8xf32>
    %57 = arith.subf %53, %56 : vector<8x8xf32>
    %58 = math.exp %57 : vector<8x8xf32>
    %cst_20 = arith.constant dense<0.000000e+00> : vector<8xf32>
    %59 = vector.multi_reduction <add>, %58, %cst_20 [1] : vector<8x8xf32> to vector<8xf32>
    %60 = vector.shape_cast %59 : vector<8xf32> to vector<8x1xf32>
    %61 = tpu.reciprocal %60 {approx = true} : vector<8x1xf32> -> vector<8x1xf32>
    %62 = vector.broadcast %61 : vector<8x1xf32> to vector<8x8xf32>
    %63 = arith.mulf %58, %62 : vector<8x8xf32>
    %64 = arith.truncf %63 : vector<8x8xf32> to vector<8x8xbf16>
    %cst_21 = arith.constant dense<0.000000e+00> : vector<8x8xf32>
    %65 = tpu.matmul %64, %50, %cst_21 {dimension_numbers = #tpu.dot_dimension_numbers<[1], [0], [0], [1], [0, 0, 1, 1], [], []>} : vector<8x8xbf16>, vector<8x8xbf16>, vector<8x8xf32> -> vector<8x8xf32>
    %66 = arith.truncf %65 : vector<8x8xf32> to vector<8x8xbf16>
    %c0_22 = arith.constant 0 : index
    %c0_23 = arith.constant 0 : index
    %c0_24 = arith.constant 0 : index
    %67 = vector.load %arg6[%c0_22, %c0_23, %c0_24] : memref<4x8x32xbf16, #tpu.memory_space<vmem>>, vector<1x8x32xbf16>
    %68 = vector.shape_cast %67 : vector<1x8x32xbf16> to vector<8x32xbf16>
    %cst_25 = arith.constant dense<0.000000e+00> : vector<8x32xf32>
    %69 = tpu.matmul %66, %68, %cst_25 {dimension_numbers = #tpu.dot_dimension_numbers<[1], [0], [0], [1], [0, 0, 1, 1], [], []>} : vector<8x8xbf16>, vector<8x32xbf16>, vector<8x32xf32> -> vector<8x32xf32>
    %70 = arith.addf %44, %69 : vector<8x32xf32>
    %71 = vector.extract_strided_slice %37 {offsets = [0, 8], sizes = [8, 8], strides = [1, 1]} : vector<8x96xf32> to vector<8x8xf32>
    %72 = arith.truncf %71 : vector<8x8xf32> to vector<8x8xbf16>
    %73 = vector.extract_strided_slice %37 {offsets = [0, 40], sizes = [8, 8], strides = [1, 1]} : vector<8x96xf32> to vector<8x8xf32>
    %74 = arith.truncf %73 : vector<8x8xf32> to vector<8x8xbf16>
    %75 = vector.extract_strided_slice %37 {offsets = [0, 72], sizes = [8, 8], strides = [1, 1]} : vector<8x96xf32> to vector<8x8xf32>
    %76 = arith.truncf %75 : vector<8x8xf32> to vector<8x8xbf16>
    %cst_26 = arith.constant dense<0.000000e+00> : vector<8x8xf32>
    %77 = tpu.matmul %72, %74, %cst_26 {dimension_numbers = #tpu.dot_dimension_numbers<[1], [1], [0], [0], [0, 0, 1, 0], [], []>} : vector<8x8xbf16>, vector<8x8xbf16>, vector<8x8xf32> -> vector<8x8xf32>
    %cst_27 = arith.constant 0xFF800000 : f32
    %78 = vector.broadcast %cst_27 : f32 to vector<8x8xf32>
    %79 = arith.select %40, %77, %78 : vector<8x8xi1>, vector<8x8xf32>
    %cst_28 = arith.constant dense<0xFF800000> : vector<8xf32>
    %80 = vector.multi_reduction <maximumf>, %79, %cst_28 [1] : vector<8x8xf32> to vector<8xf32>
    %81 = vector.shape_cast %80 : vector<8xf32> to vector<8x1xf32>
    %82 = vector.broadcast %81 : vector<8x1xf32> to vector<8x8xf32>
    %83 = arith.subf %79, %82 : vector<8x8xf32>
    %84 = math.exp %83 : vector<8x8xf32>
    %cst_29 = arith.constant dense<0.000000e+00> : vector<8xf32>
    %85 = vector.multi_reduction <add>, %84, %cst_29 [1] : vector<8x8xf32> to vector<8xf32>
    %86 = vector.shape_cast %85 : vector<8xf32> to vector<8x1xf32>
    %87 = tpu.reciprocal %86 {approx = true} : vector<8x1xf32> -> vector<8x1xf32>
    %88 = vector.broadcast %87 : vector<8x1xf32> to vector<8x8xf32>
    %89 = arith.mulf %84, %88 : vector<8x8xf32>
    %90 = arith.truncf %89 : vector<8x8xf32> to vector<8x8xbf16>
    %cst_30 = arith.constant dense<0.000000e+00> : vector<8x8xf32>
    %91 = tpu.matmul %90, %76, %cst_30 {dimension_numbers = #tpu.dot_dimension_numbers<[1], [0], [0], [1], [0, 0, 1, 1], [], []>} : vector<8x8xbf16>, vector<8x8xbf16>, vector<8x8xf32> -> vector<8x8xf32>
    %92 = arith.truncf %91 : vector<8x8xf32> to vector<8x8xbf16>
    %c1 = arith.constant 1 : index
    %c0_31 = arith.constant 0 : index
    %c0_32 = arith.constant 0 : index
    %93 = vector.load %arg6[%c1, %c0_31, %c0_32] : memref<4x8x32xbf16, #tpu.memory_space<vmem>>, vector<1x8x32xbf16>
    %94 = vector.shape_cast %93 : vector<1x8x32xbf16> to vector<8x32xbf16>
    %cst_33 = arith.constant dense<0.000000e+00> : vector<8x32xf32>
    %95 = tpu.matmul %92, %94, %cst_33 {dimension_numbers = #tpu.dot_dimension_numbers<[1], [0], [0], [1], [0, 0, 1, 1], [], []>} : vector<8x8xbf16>, vector<8x32xbf16>, vector<8x32xf32> -> vector<8x32xf32>
    %96 = arith.addf %70, %95 : vector<8x32xf32>
    %97 = vector.extract_strided_slice %37 {offsets = [0, 16], sizes = [8, 8], strides = [1, 1]} : vector<8x96xf32> to vector<8x8xf32>
    %98 = arith.truncf %97 : vector<8x8xf32> to vector<8x8xbf16>
    %99 = vector.extract_strided_slice %37 {offsets = [0, 48], sizes = [8, 8], strides = [1, 1]} : vector<8x96xf32> to vector<8x8xf32>
    %100 = arith.truncf %99 : vector<8x8xf32> to vector<8x8xbf16>
    %101 = vector.extract_strided_slice %37 {offsets = [0, 80], sizes = [8, 8], strides = [1, 1]} : vector<8x96xf32> to vector<8x8xf32>
    %102 = arith.truncf %101 : vector<8x8xf32> to vector<8x8xbf16>
    %cst_34 = arith.constant dense<0.000000e+00> : vector<8x8xf32>
    %103 = tpu.matmul %98, %100, %cst_34 {dimension_numbers = #tpu.dot_dimension_numbers<[1], [1], [0], [0], [0, 0, 1, 0], [], []>} : vector<8x8xbf16>, vector<8x8xbf16>, vector<8x8xf32> -> vector<8x8xf32>
    %cst_35 = arith.constant 0xFF800000 : f32
    %104 = vector.broadcast %cst_35 : f32 to vector<8x8xf32>
    %105 = arith.select %40, %103, %104 : vector<8x8xi1>, vector<8x8xf32>
    %cst_36 = arith.constant dense<0xFF800000> : vector<8xf32>
    %106 = vector.multi_reduction <maximumf>, %105, %cst_36 [1] : vector<8x8xf32> to vector<8xf32>
    %107 = vector.shape_cast %106 : vector<8xf32> to vector<8x1xf32>
    %108 = vector.broadcast %107 : vector<8x1xf32> to vector<8x8xf32>
    %109 = arith.subf %105, %108 : vector<8x8xf32>
    %110 = math.exp %109 : vector<8x8xf32>
    %cst_37 = arith.constant dense<0.000000e+00> : vector<8xf32>
    %111 = vector.multi_reduction <add>, %110, %cst_37 [1] : vector<8x8xf32> to vector<8xf32>
    %112 = vector.shape_cast %111 : vector<8xf32> to vector<8x1xf32>
    %113 = tpu.reciprocal %112 {approx = true} : vector<8x1xf32> -> vector<8x1xf32>
    %114 = vector.broadcast %113 : vector<8x1xf32> to vector<8x8xf32>
    %115 = arith.mulf %110, %114 : vector<8x8xf32>
    %116 = arith.truncf %115 : vector<8x8xf32> to vector<8x8xbf16>
    %cst_38 = arith.constant dense<0.000000e+00> : vector<8x8xf32>
    %117 = tpu.matmul %116, %102, %cst_38 {dimension_numbers = #tpu.dot_dimension_numbers<[1], [0], [0], [1], [0, 0, 1, 1], [], []>} : vector<8x8xbf16>, vector<8x8xbf16>, vector<8x8xf32> -> vector<8x8xf32>
    %118 = arith.truncf %117 : vector<8x8xf32> to vector<8x8xbf16>
    %c2 = arith.constant 2 : index
    %c0_39 = arith.constant 0 : index
    %c0_40 = arith.constant 0 : index
    %119 = vector.load %arg6[%c2, %c0_39, %c0_40] : memref<4x8x32xbf16, #tpu.memory_space<vmem>>, vector<1x8x32xbf16>
    %120 = vector.shape_cast %119 : vector<1x8x32xbf16> to vector<8x32xbf16>
    %cst_41 = arith.constant dense<0.000000e+00> : vector<8x32xf32>
    %121 = tpu.matmul %118, %120, %cst_41 {dimension_numbers = #tpu.dot_dimension_numbers<[1], [0], [0], [1], [0, 0, 1, 1], [], []>} : vector<8x8xbf16>, vector<8x32xbf16>, vector<8x32xf32> -> vector<8x32xf32>
    %122 = arith.addf %96, %121 : vector<8x32xf32>
    %123 = vector.extract_strided_slice %37 {offsets = [0, 24], sizes = [8, 8], strides = [1, 1]} : vector<8x96xf32> to vector<8x8xf32>
    %124 = arith.truncf %123 : vector<8x8xf32> to vector<8x8xbf16>
    %125 = vector.extract_strided_slice %37 {offsets = [0, 56], sizes = [8, 8], strides = [1, 1]} : vector<8x96xf32> to vector<8x8xf32>
    %126 = arith.truncf %125 : vector<8x8xf32> to vector<8x8xbf16>
    %127 = vector.extract_strided_slice %37 {offsets = [0, 88], sizes = [8, 8], strides = [1, 1]} : vector<8x96xf32> to vector<8x8xf32>
    %128 = arith.truncf %127 : vector<8x8xf32> to vector<8x8xbf16>
    %cst_42 = arith.constant dense<0.000000e+00> : vector<8x8xf32>
    %129 = tpu.matmul %124, %126, %cst_42 {dimension_numbers = #tpu.dot_dimension_numbers<[1], [1], [0], [0], [0, 0, 1, 0], [], []>} : vector<8x8xbf16>, vector<8x8xbf16>, vector<8x8xf32> -> vector<8x8xf32>
    %cst_43 = arith.constant 0xFF800000 : f32
    %130 = vector.broadcast %cst_43 : f32 to vector<8x8xf32>
    %131 = arith.select %40, %129, %130 : vector<8x8xi1>, vector<8x8xf32>
    %cst_44 = arith.constant dense<0xFF800000> : vector<8xf32>
    %132 = vector.multi_reduction <maximumf>, %131, %cst_44 [1] : vector<8x8xf32> to vector<8xf32>
    %133 = vector.shape_cast %132 : vector<8xf32> to vector<8x1xf32>
    %134 = vector.broadcast %133 : vector<8x1xf32> to vector<8x8xf32>
    %135 = arith.subf %131, %134 : vector<8x8xf32>
    %136 = math.exp %135 : vector<8x8xf32>
    %cst_45 = arith.constant dense<0.000000e+00> : vector<8xf32>
    %137 = vector.multi_reduction <add>, %136, %cst_45 [1] : vector<8x8xf32> to vector<8xf32>
    %138 = vector.shape_cast %137 : vector<8xf32> to vector<8x1xf32>
    %139 = tpu.reciprocal %138 {approx = true} : vector<8x1xf32> -> vector<8x1xf32>
    %140 = vector.broadcast %139 : vector<8x1xf32> to vector<8x8xf32>
    %141 = arith.mulf %136, %140 : vector<8x8xf32>
    %142 = arith.truncf %141 : vector<8x8xf32> to vector<8x8xbf16>
    %cst_46 = arith.constant dense<0.000000e+00> : vector<8x8xf32>
    %143 = tpu.matmul %142, %128, %cst_46 {dimension_numbers = #tpu.dot_dimension_numbers<[1], [0], [0], [1], [0, 0, 1, 1], [], []>} : vector<8x8xbf16>, vector<8x8xbf16>, vector<8x8xf32> -> vector<8x8xf32>
    %144 = arith.truncf %143 : vector<8x8xf32> to vector<8x8xbf16>
    %c3 = arith.constant 3 : index
    %c0_47 = arith.constant 0 : index
    %c0_48 = arith.constant 0 : index
    %145 = vector.load %arg6[%c3, %c0_47, %c0_48] : memref<4x8x32xbf16, #tpu.memory_space<vmem>>, vector<1x8x32xbf16>
    %146 = vector.shape_cast %145 : vector<1x8x32xbf16> to vector<8x32xbf16>
    %cst_49 = arith.constant dense<0.000000e+00> : vector<8x32xf32>
    %147 = tpu.matmul %144, %146, %cst_49 {dimension_numbers = #tpu.dot_dimension_numbers<[1], [0], [0], [1], [0, 0, 1, 1], [], []>} : vector<8x8xbf16>, vector<8x32xbf16>, vector<8x32xf32> -> vector<8x32xf32>
    %148 = arith.addf %122, %147 : vector<8x32xf32>
    %149 = arith.addf %1, %148 : vector<8x32xf32>
    %c0_50 = arith.constant 0 : index
    %c0_51 = arith.constant 0 : index
    %150 = vector.load %arg8[%c0_50, %c0_51] : memref<1x32xf32, #tpu.memory_space<vmem>>, vector<1x32xf32>
    %151 = vector.shape_cast %150 : vector<1x32xf32> to vector<32xf32>
    %c0_52 = arith.constant 0 : index
    %c0_53 = arith.constant 0 : index
    %152 = vector.load %arg9[%c0_52, %c0_53] : memref<1x32xf32, #tpu.memory_space<vmem>>, vector<1x32xf32>
    %153 = vector.shape_cast %152 : vector<1x32xf32> to vector<32xf32>
    %cst_54 = arith.constant dense<0.000000e+00> : vector<8xf32>
    %154 = vector.multi_reduction <add>, %149, %cst_54 [1] : vector<8x32xf32> to vector<8xf32>
    %155 = vector.shape_cast %154 : vector<8xf32> to vector<8x1xf32>
    %cst_55 = arith.constant 3.200000e+01 : f32
    %156 = vector.broadcast %cst_55 : f32 to vector<8x1xf32>
    %157 = arith.divf %155, %156 : vector<8x1xf32>
    %158 = vector.broadcast %157 : vector<8x1xf32> to vector<8x32xf32>
    %159 = arith.subf %149, %158 : vector<8x32xf32>
    %160 = arith.mulf %159, %159 : vector<8x32xf32>
    %cst_56 = arith.constant dense<0.000000e+00> : vector<8xf32>
    %161 = vector.multi_reduction <add>, %160, %cst_56 [1] : vector<8x32xf32> to vector<8xf32>
    %162 = vector.shape_cast %161 : vector<8xf32> to vector<8x1xf32>
    %cst_57 = arith.constant 3.200000e+01 : f32
    %163 = vector.broadcast %cst_57 : f32 to vector<8x1xf32>
    %164 = arith.divf %162, %163 : vector<8x1xf32>
    %165 = vector.broadcast %157 : vector<8x1xf32> to vector<8x32xf32>
    %166 = arith.subf %149, %165 : vector<8x32xf32>
    %cst_58 = arith.constant 9.99999974E-6 : f32
    %167 = vector.broadcast %cst_58 : f32 to vector<8x1xf32>
    %168 = arith.addf %164, %167 : vector<8x1xf32>
    %169 = math.rsqrt %168 : vector<8x1xf32>
    %170 = vector.broadcast %169 : vector<8x1xf32> to vector<8x32xf32>
    %171 = arith.mulf %166, %170 : vector<8x32xf32>
    %172 = vector.shape_cast %151 : vector<32xf32> to vector<1x32xf32>
    %173 = vector.broadcast %172 : vector<1x32xf32> to vector<8x32xf32>
    %174 = arith.mulf %171, %173 : vector<8x32xf32>
    %175 = vector.shape_cast %153 : vector<32xf32> to vector<1x32xf32>
    %176 = vector.broadcast %175 : vector<1x32xf32> to vector<8x32xf32>
    %177 = arith.addf %174, %176 : vector<8x32xf32>
    %178 = arith.truncf %177 : vector<8x32xf32> to vector<8x32xbf16>
    %c0_59 = arith.constant 0 : index
    %c0_60 = arith.constant 0 : index
    %179 = vector.load %arg10[%c0_59, %c0_60] : memref<32x128xbf16, #tpu.memory_space<vmem>>, vector<32x128xbf16>
    %cst_61 = arith.constant dense<0.000000e+00> : vector<8x128xf32>
    %180 = tpu.matmul %178, %179, %cst_61 {dimension_numbers = #tpu.dot_dimension_numbers<[1], [0], [0], [1], [0, 0, 1, 1], [], []>} : vector<8x32xbf16>, vector<32x128xbf16>, vector<8x128xf32> -> vector<8x128xf32>
    %c0_62 = arith.constant 0 : index
    %c0_63 = arith.constant 0 : index
    %181 = vector.load %arg11[%c0_62, %c0_63] : memref<1x128xf32, #tpu.memory_space<vmem>>, vector<1x128xf32>
    %182 = vector.shape_cast %181 : vector<1x128xf32> to vector<128xf32>
    %183 = vector.shape_cast %182 : vector<128xf32> to vector<1x128xf32>
    %184 = vector.broadcast %183 : vector<1x128xf32> to vector<8x128xf32>
    %185 = arith.addf %180, %184 : vector<8x128xf32>
    %cst_64 = arith.constant 5.000000e-01 : f32
    %186 = vector.broadcast %cst_64 : f32 to vector<8x128xf32>
    %187 = arith.mulf %186, %185 : vector<8x128xf32>
    %cst_65 = arith.constant 4.471500e-02 : f32
    %188 = vector.broadcast %cst_65 : f32 to vector<8x128xf32>
    %189 = arith.mulf %188, %185 : vector<8x128xf32>
    %190 = arith.mulf %189, %185 : vector<8x128xf32>
    %191 = arith.mulf %190, %185 : vector<8x128xf32>
    %192 = arith.addf %185, %191 : vector<8x128xf32>
    %cst_66 = arith.constant 0.797884583 : f32
    %193 = vector.broadcast %cst_66 : f32 to vector<8x128xf32>
    %194 = arith.mulf %193, %192 : vector<8x128xf32>
    %195 = math.tanh %194 : vector<8x128xf32>
    %cst_67 = arith.constant 1.000000e+00 : f32
    %196 = vector.broadcast %cst_67 : f32 to vector<8x128xf32>
    %197 = arith.addf %196, %195 : vector<8x128xf32>
    %198 = arith.mulf %187, %197 : vector<8x128xf32>
    %199 = arith.truncf %198 : vector<8x128xf32> to vector<8x128xbf16>
    %c0_68 = arith.constant 0 : index
    %c0_69 = arith.constant 0 : index
    %200 = vector.load %arg12[%c0_68, %c0_69] : memref<128x32xbf16, #tpu.memory_space<vmem>>, vector<128x32xbf16>
    %cst_70 = arith.constant dense<0.000000e+00> : vector<8x32xf32>
    %201 = tpu.matmul %199, %200, %cst_70 {dimension_numbers = #tpu.dot_dimension_numbers<[1], [0], [0], [1], [0, 0, 1, 1], [], []>} : vector<8x128xbf16>, vector<128x32xbf16>, vector<8x32xf32> -> vector<8x32xf32>
    %c0_71 = arith.constant 0 : index
    %c0_72 = arith.constant 0 : index
    %202 = vector.load %arg13[%c0_71, %c0_72] : memref<1x32xf32, #tpu.memory_space<vmem>>, vector<1x32xf32>
    %203 = vector.shape_cast %202 : vector<1x32xf32> to vector<32xf32>
    %204 = vector.shape_cast %203 : vector<32xf32> to vector<1x32xf32>
    %205 = vector.broadcast %204 : vector<1x32xf32> to vector<8x32xf32>
    %206 = arith.addf %201, %205 : vector<8x32xf32>
    %207 = arith.addf %149, %206 : vector<8x32xf32>
    %c0_73 = arith.constant 0 : index
    %c0_74 = arith.constant 0 : index
    %c0_75 = arith.constant 0 : index
    %208 = vector.load %arg14[%c0_73, %c0_74, %c0_75] : memref<1x8x32xf32, #tpu.memory_space<vmem>>, vector<1x8x32xf32>
    %209 = vector.shape_cast %208 : vector<1x8x32xf32> to vector<8x32xf32>
    %210 = vector.shape_cast %207 : vector<8x32xf32> to vector<1x8x32xf32>
    tpu.vector_store %arg14[%c0_73, %c0_74, %c0_75], %210 {strides = array<i32>} : memref<1x8x32xf32, #tpu.memory_space<vmem>>, vector<1x8x32xf32>,
    return
  }
  func.func @transform_0(%arg0: i32) -> (i32, i32, i32) {
    %c0_i32 = arith.constant 0 : i32
    %c0_i32_0 = arith.constant 0 : i32
    %c0_i32_1 = arith.constant 0 : i32
    return %arg0, %c0_i32, %c0_i32_0 : i32, i32, i32
  }
  func.func @transform_1(%arg0: i32) -> (i32, i32) {
    %c0_i32 = arith.constant 0 : i32
    %c0_i32_0 = arith.constant 0 : i32
    %c0_i32_1 = arith.constant 0 : i32
    return %c0_i32, %c0_i32_0 : i32, i32
  }
  func.func @transform_2(%arg0: i32) -> (i32, i32) {
    %c0_i32 = arith.constant 0 : i32
    %c0_i32_0 = arith.constant 0 : i32
    %c0_i32_1 = arith.constant 0 : i32
    return %c0_i32, %c0_i32_0 : i32, i32
  }
  func.func @transform_3(%arg0: i32) -> (i32, i32) {
    %c0_i32 = arith.constant 0 : i32
    %c0_i32_0 = arith.constant 0 : i32
    %c0_i32_1 = arith.constant 0 : i32
    return %c0_i32, %c0_i32_0 : i32, i32
  }
  func.func @transform_4(%arg0: i32) -> (i32, i32) {
    %c0_i32 = arith.constant 0 : i32
    %c0_i32_0 = arith.constant 0 : i32
    %c0_i32_1 = arith.constant 0 : i32
    return %c0_i32, %c0_i32_0 : i32, i32
  }
  func.func @transform_5(%arg0: i32) -> (i32, i32, i32) {
    %c0_i32 = arith.constant 0 : i32
    %c0_i32_0 = arith.constant 0 : i32
    %c0_i32_1 = arith.constant 0 : i32
    %c0_i32_2 = arith.constant 0 : i32
    return %c0_i32, %c0_i32_0, %c0_i32_1 : i32, i32, i32
  }
  func.func @transform_6(%arg0: i32) -> (i32, i32) {
    %c0_i32 = arith.constant 0 : i32
    %c0_i32_0 = arith.constant 0 : i32
    %c0_i32_1 = arith.constant 0 : i32
    return %c0_i32, %c0_i32_0 : i32, i32
  }
  func.func @transform_7(%arg0: i32) -> (i32, i32) {
    %c0_i32 = arith.constant 0 : i32
    %c0_i32_0 = arith.constant 0 : i32
    %c0_i32_1 = arith.constant 0 : i32
    return %c0_i32, %c0_i32_0 : i32, i32
  }
  func.func @transform_8(%arg0: i32) -> (i32, i32) {
    %c0_i32 = arith.constant 0 : i32
    %c0_i32_0 = arith.constant 0 : i32
    %c0_i32_1 = arith.constant 0 : i32
    return %c0_i32, %c0_i32_0 : i32, i32
  }
  func.func @transform_9(%arg0: i32) -> (i32, i32) {
    %c0_i32 = arith.constant 0 : i32
    %c0_i32_0 = arith.constant 0 : i32
    %c0_i32_1 = arith.constant 0 : i32
    return %c0_i32, %c0_i32_0 : i32, i32
  }
  func.func @transform_10(%arg0: i32) -> (i32, i32) {
    %c0_i32 = arith.constant 0 : i32
    %c0_i32_0 = arith.constant 0 : i32
    %c0_i32_1 = arith.constant 0 : i32
    return %c0_i32, %c0_i32_0 : i32, i32
  }
  func.func @transform_11(%arg0: i32) -> (i32, i32) {
    %c0_i32 = arith.constant 0 : i32
    %c0_i32_0 = arith.constant 0 : i32
    %c0_i32_1 = arith.constant 0 : i32
    return %c0_i32, %c0_i32_0 : i32, i32
  }
  func.func @transform_12(%arg0: i32) -> (i32, i32) {
    %c0_i32 = arith.constant 0 : i32
    %c0_i32_0 = arith.constant 0 : i32
    %c0_i32_1 = arith.constant 0 : i32
    return %c0_i32, %c0_i32_0 : i32, i32
  }
  func.func @transform_13(%arg0: i32) -> (i32, i32, i32) {
    %c0_i32 = arith.constant 0 : i32
    %c0_i32_0 = arith.constant 0 : i32
    %c0_i32_1 = arith.constant 0 : i32
    return %arg0, %c0_i32, %c0_i32_0 : i32, i32, i32
  }
}

</mosaic_0001>

<bundles_post_ra>
// kernel: tpu_custom_call.1
= control target key start
LH: loop header
LB: loop body
LE: loop exit
PB: predicated region body
PF: predicated region fallthrough
CT: control target
= control target key end

     0   :  { %s2221_s0 = inlined_call_operand.vmem [shape: f32[2,8,32], index: 0, kind: input, shape index: {}]   ;;  %s2222_s1 = inlined_call_operand.vmem [shape: f32[1,32], index: 1, kind: input, shape index: {}]   ;;  %s2223_s2 = inlined_call_operand.vmem [shape: f32[1,32], index: 2, kind: input, shape index: {}]   ;;  %s2224_s3 = inlined_call_operand.vmem [shape: bf16[32,96], index: 3, kind: input, shape index: {}]   ;;  %s2225_s4 = inlined_call_operand.vmem [shape: f32[1,96], index: 4, kind: input, shape index: {}]   ;;  %s2226_s5 = inlined_call_operand.vmem [shape: bf16[4,8,32], index: 5, kind: input, shape index: {}]   ;;  %s2227_s6 = inlined_call_operand.vmem [shape: f32[1,32], index: 6, kind: input, shape index: {}]   ;;  %s2228_s7 = inlined_call_operand.vmem [shape: f32[1,32], index: 7, kind: input, shape index: {}]   ;;  %s2229_s8 = inlined_call_operand.vmem [shape: f32[1,32], index: 8, kind: input, shape index: {}]   ;;  %s2230_s9 = inlined_call_operand.vmem [shape: bf16[32,128], index: 9, kind: input, shape index: {}]   ;;  %s2231_s10 = inlined_call_operand.vmem [shape: f32[1,128], index: 10, kind: input, shape index: {}]   ;;  %s2232_s11 = inlined_call_operand.vmem [shape: bf16[128,32], index: 11, kind: input, shape index: {}]   ;;  %s2233_s12 = inlined_call_operand.vmem [shape: f32[1,32], index: 12, kind: input, shape index: {}]   ;;  %s2234_s13 = inlined_call_operand.hbm [shape: f32[2,8,32], index: 13, kind: output, shape index: {}]  }
   0x1   :  { %2235 = sst [smem:[#allocation5_spill]] %s2221_s0 }
   0x2   :  { %2236 = sst [smem:[#allocation6_spill]] %s2222_s1 }
   0x3   :  { %2237 = sst [smem:[#allocation7_spill]] %s2223_s2 }
   0x4   :  { %18 = vsyncpa [#allocation3], 0 }
   0x5   :  { %20 = vsyncpa [#allocation3 + $0x1], 0  ;;  %s1914_s25 = smov 0   ;;  %s1916_s26 = smov 0  }
   0x6   :  { %s1918_s27 = smov 0   ;;  %s1920_s28 = smov 0  }
   0x7 LB: > { %s1935_s29 = sadd.s32 4294967295, %s1828_s28   ;;  %s1486_s30 = sadd.s32 4294967294, %s1828_s28   ;;  %s1828_s28 = sphi %s1920_s28, %s2246_s28   ;;  %s1824_s27 = sphi %s1918_s27, %s2245_s27   ;;  %s1820_s26 = sphi %s1916_s26, %s2244_s26   ;;  %s1816_s25 = sphi %s1914_s25, %s2243_s25  }
   0x8   : > { %s1939_s14 = sadd.s32 1, %s1828_s28   ;;  %s311_s15 = sadd.s32 1, %s1824_s27 }
   0x9   : > { %s308_s16 = ssub.s32 %s1828_s28, %s1939_s14  ;;  %p321_p0 = scmp.ne.s32.totalorder %s1824_s27, %s1820_s26 }
   0xa   : > { %p309_p1 = scmp.eq.s32.totalorder %s308_s16, 0  ;;  %p322_p2 = scmp.eq.s32.totalorder %s1935_s29, 1 }
   0xb   : > { %p327_p3 = scmp.ne.s32.totalorder %s1820_s26, %s1816_s25  ;;  %p328_p4 = scmp.eq.s32.totalorder %s1486_s30, 1 }
   0xc   : > { %s1950_s17 = scalar_select %p309_p1, %s1824_s27, %s311_s15  }
   0xd   : > { %p1952_p5 = por %p322_p2, %p321_p0  ;;  %p1956_p6 = por %p328_p4, %p327_p3 }
   0xe   : > { %p1489_p7 = scmp.ge.s32.totalorder %s1828_s28, 1  ;;  %p389_p8 = scmp.lt.s32.totalorder %s1828_s28, 3 }
  0x10   : > { %p390_p9 = pnand %p1489_p7, %p389_p8 }
  0x11   : > { %p432_p10 = scmp.lt.s32.totalorder (!%p390_p9), %s1935_s29, 1  ;;  %vm440_vm0 = vcmask (!%p390_p9), 261120   ;;  %s2240_s0 = sld [smem:[#allocation5_spill]] (!%p390_p9)  ;;  %v1732_v7 = vld [vmem:[%s2224_s3] sm:$0xff] (!%p390_p9)   ;;  %v1830_v8 = vmov (!%p390_p9), 0.0   ;;  %vm1831_vm1 = vmmov (!%p390_p9), 0   ;;  %v536_v32 = vlaneseq (!%p390_p9) }
  0x12   : > { %393 = sbr.rel (%p390_p9) target bundleno = 3726 (0xe8e), region = 72  ;;  %1572 = vmatprep.subr.bf16.mxu1 (!%p390_p9), %v1830_v8  ;;  %1576 = vmatprep.mubr.msk.bf16.mxu1 (!%p390_p9), %vm1831_vm1, %v1830_v8  ;;  %v1733_v9 = vld [vmem:[%s2224_s3 + $0x8] sm:$0xff] (!%p390_p9)   ;;  %s2241_s1 = sld [smem:[#allocation6_spill]] (!%p390_p9)  ;;  %v1494_v20 = vld [vmem:[%s2225_s4] ss:$0 sm:$0xff] (!%p390_p9)  ;;  %vm552_vm2 = vcmask (!%p390_p9), 64512  }
  0x13   : > { %1573 = vmatpush3.bf16.msra.mxu1 (!%p390_p9), %v1732_v7  ;;  %1598 = vmatprep.subr.bf16.mxu0 (!%p390_p9), %v1830_v8  ;;  %s2242_s2 = sld [smem:[#allocation7_spill]] (!%p390_p9)  ;;  %s1832_s16 = smov (!%p390_p9), 120   ;;  %v2015_v33 = vshrl.u32 (!%p390_p9), %v536_v32, 7  ;;  %v2017_v34 = vand.u32 (!%p390_p9), 127, %v536_v32  ;;  %vm617_vm4 = vcmask (!%p390_p9), 1043456  }
  0x14   : > { %1574 = vmatprep.subr.bf16.mxu1 (!%p390_p9), %v1830_v8  ;;  %1600 = vmatprep.mubr.msk.bf16.mxu0 (!%p390_p9), %vm1831_vm1, %v1830_v8  ;;  %s1835_s22 = smov (!%p390_p9), 64   ;;  %s1836_s23 = smov (!%p390_p9), 56   ;;  %v662_v63 = vld [vmem:[%s2226_s5] sm:$0xf] (!%p390_p9) }
  0x15   : > { %vm540_vm3 = vcmp.le.s32.totalorder (!%p390_p9), %v2017_v34, %v2015_v33  ;;  %s1838_s30 = smov (!%p390_p9), 112   ;;  %s1839_s15 = smov (!%p390_p9), 48  }
  0x17   : > { %1575 = vmatpush3.bf16.msra.mxu1 (!%p390_p9), %v1733_v9 }
  0x18   : > { %1580 = vmatprep.subr.bf16.mxu1 (!%p390_p9), %v1830_v8  ;;  %v1492_v14 = vld [vmem:[%s2241_s1] ss:$0 sm:$0xff] (!%p390_p9) }
  0x19   : > { %s433_s20 = scalar_select %p432_p10, %s1935_s29, 1  ;;  %v1493_v16 = vld [vmem:[%s2242_s2] ss:$0 sm:$0xff] }
  0x1b   : > { %s1491_s21 = sshll.u32 %s433_s20, 3  ;;  %s1833_s20 = smov 96  }
  0x1c   : > { %s435_s24 = scalar_lea.vmem %s2240_s0, %s1491_s21  ;;  %s1834_s21 = smov 88  }
  0x1d   : > { %v1967_v0 = vld [vmem:[%s435_s24] sm:$0xff]  ;;  %s1837_s24 = smov 80  }
  0x1e   : > { %v441_v1 = vsel %vm440_vm0, %v1967_v0, 0.0 }
  0x1f   : > { %442 = vadd.xlane.f32.xlu0 %v441_v1  ;;  %v667_v1 = vsel %vm617_vm4, %v662_v63, 0 }
  0xac   : > { %v443_v2 = vpop.xlane.xlu0 %442 }
  0xad   : > { %v445_v3 = vmul.f32 0.03125, %v443_v2 }
  0xaf   : > { %v446_v4 = vsub.f32 %v1967_v0, %v445_v3 }
  0xb1   : > { %v447_v5 = vmul.f32 %v446_v4, %v446_v4 }
  0xb3   : > { %v448_v6 = vsel %vm440_vm0, %v447_v5, 0.0 }
  0xb4   : > { %449 = vadd.xlane.f32.xlu0 %v448_v6 }
 0x141   : > { %v450_v10 = vpop.xlane.xlu0 %449 }
 0x142   : > { %v451_v11 = vmul.f32 0.03125, %v450_v10 }
 0x144   : > { %v452_v12 = vadd.f32 1e-05, %v451_v11 }
 0x146   : > { %1744 = vrsqrt.f32 %v452_v12 }
 0x150   : > { %v1745_v13 = vpop.eup %1744 }
 0x151   : > { %v454_v15 = vmul.f32 %v1745_v13, %v446_v4 }
 0x153   : > { %v461_v17 = vmul.f32 %v1492_v14, %v454_v15 }
 0x155   : > { %v468_v18 = vadd.f32 %v1493_v16, %v461_v17  ;;  %v1504_v17 = vld [vmem:[%s2226_s5 + $0x4] sm:$0xf] }
 0x157   : > { %v469_v19 = vpack.c.bf16 %v468_v18, %v468_v18  ;;  %v828_v18 = vsel %vm617_vm4, %v1504_v17, 0 }
 0x159   : > { %1577 = vmatmul.mubr.msk.bf16.vlgmr.msra.gmra.mrb[0].mxu1 %vm440_vm0, %v469_v19 }
 0x15a   : > { %1582 = vmatprep.mubr.msk.bf16.mxu1 %vm1831_vm1, %v1830_v8 }
 0x22c   : > { %v530_v21 = vpop.f32.mrb[0].mxu1 }
 0x22d   : > { %v531_v22 = vadd.f32 %v1494_v20, %v530_v21  ;;  %v1578_v23 = vpop.f32.mrb[1].mxu1 }
 0x22e   : > { %v533_v24 = vpop.f32.mrb[2].mxu1 }
 0x22f   : > { %v1999_v25 = vpack.c.bf16 %v531_v22, %v531_v22  ;;  %v1579_v26 = vpop.f32.mrb[3].mxu1 }
 0x231   : > { %710 = vrot.lane.b32.xlu0 %v1999_v25, %s1832_s16  ;;  %550 = vrot.lane.b32.xlu1 %v1999_v25, %s1833_s20  ;;  %s1843_s20 = smov [#allocation2]  }
 0x235   : > { %712 = vrot.lane.b32.xlu1 %v1999_v25, %s1834_s21  ;;  %s1842_s21 = smov 40  }
 0x2a3   : > { %v551_v27 = vpop.permute.xlu1 %550  ;;  %v711_v31 = vpop.permute.xlu0 %710 }
 0x2a4   : > { %v557_v28 = vsel %vm552_vm2, %v551_v27, 0 }
 0x2a5   : > { %1581 = vmatpush3.bf16.xpose.msra.mxu1 %v557_v28 }
 0x2a6   : > { %1586 = vmatprep.subr.bf16.mxu1 %v1830_v8 }
 0x2a7   : > { %v713_v29 = vpop.permute.xlu1 %712 }
 0x2a8   : > { %v718_v30 = vsel %vm552_vm2, %v713_v29, 0 }
 0x2a9   : > { %1599 = vmatpush3.bf16.xpose.msra.mxu0 %v718_v30 }
 0x2aa   : > { %1610 = vmatprep.subr.bf16.mxu0 %v1830_v8 }
 0x2ac   : > { %1583 = vmatmul.mubr.msk.bf16.vlgmr.msra.gmra.mrb[4].mxu1 %vm552_vm2, %v1999_v25 }
 0x2ad   : > { %1588 = vmatprep.mubr.msk.bf16.mxu1 %vm1831_vm1, %v1830_v8 }
 0x2b0   : > { %1601 = vmatmul.mubr.msk.bf16.vlgmr.msra.gmra.mrb[0].mxu0 %vm552_vm2, %v711_v31 }
 0x2b1   : > { %1612 = vmatprep.mubr.msk.bf16.mxu0 %vm1831_vm1, %v1830_v8  ;;  %1611 = vmatpush3.bf16.msra.mxu0 %v828_v18 }
 0x2b2   : > { %1622 = vmatprep.subr.bf16.mxu0 %v1830_v8 }
 0x37f   : > { %v593_v35 = vpop.f32.mrb[4].mxu1 }
 0x380   : > { %v599_v36 = vsel %vm540_vm3, %v593_v35, -inf  ;;  %v1584_v37 = vpop.f32.mrb[5].mxu1 }
 0x381   : > { %v596_v38 = vpop.f32.mrb[6].mxu1  ;;  %v600_v39 = vsel %vm552_vm2, %v599_v36, -inf }
 0x382   : > { %601 = vmax.xlane.f32.xlu1 %v600_v39  ;;  %v1585_v40 = vpop.f32.mrb[7].mxu1 }
 0x383   : > { %v754_v41 = vpop.f32.mrb[0].mxu0 }
 0x384   : > { %v1602_v42 = vpop.f32.mrb[1].mxu0  ;;  %v760_v52 = vsel %vm540_vm3, %v754_v41, -inf }
 0x385   : > { %v757_v43 = vpop.f32.mrb[2].mxu0  ;;  %v761_v53 = vsel %vm552_vm2, %v760_v52, -inf }
 0x386   : > { %v1603_v44 = vpop.f32.mrb[3].mxu0 }
 0x387   : > { %v1498_v44 = vld [vmem:[%s2227_s6] ss:$0 sm:$0xff] }
 0x393   : > { %612 = vrot.lane.b32.xlu1 %v1999_v25, %s1835_s22  ;;  %s1530_s22 = sshll.u32 %s1935_s29, 7 }
 0x394   : > { %s2178_s1 = scalar_lea.hbm %s2234_s13, %s1530_s22 }
 0x40f   : > { %v602_v45 = vpop.xlane.xlu1 %601 }
 0x410   : > { %v603_v46 = vsub.f32 %v599_v36, %v602_v45 }
 0x412   : > { %v604_v47 = vmul.f32 1.442695, %v603_v46 }
 0x413   : > { %v613_v48 = vpop.permute.xlu1 %612 }
 0x414   : > { %1746 = vpow2.f32 %v604_v47  ;;  %v619_v49 = vsel %vm617_vm4, %v613_v48, 0 }
 0x415   : > { %1587 = vmatpush3.bf16.msra.mxu1 %v619_v49 }
 0x416   : > { %1592 = vmatprep.subr.bf16.mxu1 %v1830_v8 }
 0x41e   : > { %v1747_v50 = vpop.eup %1746 }
 0x41f   : > { %v606_v51 = vsel %vm552_vm2, %v1747_v50, 0.0 }
 0x420   : > { %607 = vadd.xlane.f32.xlu0 %v606_v51 }
 0x424   : > { %762 = vmax.xlane.f32.xlu0 %v761_v53 }
 0x43a   : > { %773 = vrot.lane.b32.xlu0 %v1999_v25, %s1836_s23  ;;  %s1840_s23 = smov 72  }
 0x43e   : > { %873 = vrot.lane.b32.xlu0 %v1999_v25, %s1837_s24  ;;  %s1841_s24 = smov 104  }
 0x442   : > { %871 = vrot.lane.b32.xlu0 %v1999_v25, %s1838_s30 }
 0x4ad   : > { %v608_v54 = vpop.xlane.xlu0 %607 }
 0x4ae   : > { %1748 = vrcp.f32 %v608_v54 }
 0x4b1   : > { %v763_v55 = vpop.xlane.xlu0 %762 }
 0x4b2   : > { %v764_v56 = vsub.f32 %v760_v52, %v763_v55 }
 0x4b4   : > { %v765_v57 = vmul.f32 1.442695, %v764_v56 }
 0x4b5   : > { %v774_v3 = vpop.permute.xlu0 %773 }
 0x4b6   : > { %1750 = vpow2.f32 %v765_v57  ;;  %v779_v10 = vsel %vm617_vm4, %v774_v3, 0 }
 0x4b8   : > { %v1749_v58 = vpop.eup %1748 }
 0x4b9   : > { %v610_v59 = vmul.f32 %v1749_v58, %v1747_v50  ;;  %v874_v13 = vpop.permute.xlu0 %873  ;;  %v1508_v58 = vld [vmem:[%s2226_s5 + $0x8] sm:$0xf] }
 0x4ba   : > { %v879_v15 = vsel %vm552_vm2, %v874_v13, 0 }
 0x4bb   : > { %v611_v60 = vpack.c.bf16 %v610_v59, %v610_v59  ;;  %v989_v59 = vsel %vm617_vm4, %v1508_v58, 0  ;;  %v1739_v58 = vld [vmem:[%s2232_s11 + $0x18] sm:$0xff]  }
 0x4bd   : > { %1589 = vmatmul.mubr.msk.bf16.vlgmr.msra.gmra.mrb[8].mxu1 %vm552_vm2, %v611_v60  ;;  %v872_v16 = vpop.permute.xlu0 %871 }
 0x4be   : > { %1594 = vmatprep.mubr.msk.bf16.mxu1 %vm1831_vm1, %v1830_v8  ;;  %1593 = vmatpush3.bf16.msra.mxu1 %v667_v1 }
 0x4bf   : > { %1604 = vmatprep.subr.bf16.mxu1 %v1830_v8 }
 0x4c0   : > { %v1751_v61 = vpop.eup %1750 }
 0x4c1   : > { %v767_v62 = vsel %vm552_vm2, %v1751_v61, 0.0 }
 0x4c2   : > { %768 = vadd.xlane.f32.xlu1 %v767_v62 }
 0x4d3   : > { %934 = vrot.lane.b32.xlu1 %v1999_v25, %s1839_s15  ;;  %s429_s15 = sand.u32 1, %s1820_s26  }
 0x4d4   : > { %s1490_s16 = sshll.u32 %s429_s15, 3  ;;  %s1414_s29 = scalar_lea.sflag [#allocation3], %s429_s15 }
 0x54f   : > { %v769_v2 = vpop.xlane.xlu1 %768 }
 0x550   : > { %1752 = vrcp.f32 %v769_v2 }
 0x553   : > { %v935_v23 = vpop.permute.xlu1 %934 }
 0x554   : > { %v940_v29 = vsel %vm617_vm4, %v935_v23, 0 }
 0x55a   : > { %v1753_v7 = vpop.eup %1752 }
 0x55b   : > { %v771_v12 = vmul.f32 %v1753_v7, %v1751_v61 }
 0x55d   : > { %v772_v14 = vpack.c.bf16 %v771_v12, %v771_v12 }
 0x590   : > { %v655_v4 = vpop.f32.mrb[8].mxu1 }
 0x591   : > { %v661_v5 = vpack.c.bf16 %v655_v4, %v655_v4  ;;  %v1590_v6 = vpop.f32.mrb[9].mxu1 }
 0x592   : > { %v658_v9 = vpop.f32.mrb[10].mxu1 }
 0x593   : > { %v1591_v11 = vpop.f32.mrb[11].mxu1  ;;  %1595 = vmatmul.mubr.msk.bf16.vlgmr.msra.gmra.mrb[12].mxu1 %vm552_vm2, %v661_v5 }
 0x594   : > { %1605 = vmatpush3.bf16.msra.mxu1 %v779_v10  ;;  %1606 = vmatprep.mubr.msk.bf16.mxu1 %vm1831_vm1, %v1830_v8 }
 0x595   : > { %1616 = vmatprep.subr.bf16.mxu1 %v1830_v8 }
 0x59b   : > { %1607 = vmatmul.mubr.msk.bf16.vlgmr.msra.gmra.mrb[16].mxu1 %vm552_vm2, %v772_v14  ;;  %v1512_v14 = vld [vmem:[%s2226_s5 + $0xc] sm:$0xf] }
 0x59c   : > { %1618 = vmatprep.mubr.msk.bf16.mxu1 %vm1831_vm1, %v1830_v8 }
 0x59d   : > { %1617 = vmatpush3.bf16.xpose.msra.mxu1 %v879_v15 }
 0x59e   : > { %1628 = vmatprep.subr.bf16.mxu1 %v1830_v8 }
 0x5a4   : > { %1619 = vmatmul.mubr.msk.bf16.vlgmr.msra.gmra.mrb[20].mxu1 %vm552_vm2, %v872_v16 }
 0x5a5   : > { %1630 = vmatprep.mubr.msk.bf16.mxu1 %vm1831_vm1, %v1830_v8  ;;  %1629 = vmatpush3.bf16.msra.mxu1 %v989_v59  ;;  %v1740_v59 = vld [vmem:[%s2232_s11 + $0x20] sm:$0xff]  }
 0x5a6   : > { %1640 = vmatprep.subr.bf16.mxu1 %v1830_v8 }
 0x666   : > { %v703_v19 = vpop.f32.mrb[12].mxu1 }
 0x667   : > { %v1596_v20 = vpop.f32.mrb[13].mxu1  ;;  %v709_v45 = vadd.f32 %v1498_v44, %v703_v19  ;;  %v1734_v44 = vld [vmem:[%s2230_s9] sm:$0xff]  }
 0x668   : > { %v706_v21 = vpop.f32.mrb[14].mxu1 }
 0x669   : > { %v1597_v22 = vpop.f32.mrb[15].mxu1 }
 0x66e   : > { %v815_v24 = vpop.f32.mrb[16].mxu1 }
 0x66f   : > { %v821_v26 = vpack.c.bf16 %v815_v24, %v815_v24  ;;  %v1608_v27 = vpop.f32.mrb[17].mxu1 }
 0x670   : > { %v818_v28 = vpop.f32.mrb[18].mxu1 }
 0x671   : > { %v1609_v30 = vpop.f32.mrb[19].mxu1  ;;  %1613 = vmatmul.mubr.msk.bf16.vlgmr.msra.gmra.mrb[4].mxu0 %vm552_vm2, %v821_v26 }
 0x672   : > { %1623 = vmatpush3.bf16.msra.mxu0 %v940_v29  ;;  %1624 = vmatprep.mubr.msk.bf16.mxu0 %vm1831_vm1, %v1830_v8 }
 0x673   : > { %1634 = vmatprep.subr.bf16.mxu0 %v1830_v8 }
 0x677   : > { %v915_v31 = vpop.f32.mrb[20].mxu1 }
 0x678   : > { %v921_v32 = vsel %vm540_vm3, %v915_v31, -inf  ;;  %v1620_v35 = vpop.f32.mrb[21].mxu1 }
 0x679   : > { %v918_v36 = vpop.f32.mrb[22].mxu1  ;;  %v922_v37 = vsel %vm552_vm2, %v921_v32, -inf }
 0x67a   : > { %923 = vmax.xlane.f32.xlu0 %v922_v37  ;;  %v1621_v38 = vpop.f32.mrb[23].mxu1 }
 0x707   : > { %v924_v39 = vpop.xlane.xlu0 %923 }
 0x708   : > { %v925_v40 = vsub.f32 %v921_v32, %v924_v39 }
 0x70a   : > { %v926_v41 = vmul.f32 1.442695, %v925_v40 }
 0x70c   : > { %1754 = vpow2.f32 %v926_v41 }
 0x716   : > { %v1755_v42 = vpop.eup %1754 }
 0x717   : > { %v928_v43 = vsel %vm552_vm2, %v1755_v42, 0.0 }
 0x718   : > { %929 = vadd.xlane.f32.xlu1 %v928_v43 }
 0x729   : > { %1034 = vrot.lane.b32.xlu1 %v1999_v25, %s1840_s23  ;;  %s431_s23 = scalar_lea.vmem [#allocation2], %s1490_s16 }
 0x72d   : > { %1032 = vrot.lane.b32.xlu1 %v1999_v25, %s1841_s24  ;;  %s1427_s24 = sshll.u32 %s431_s23, 4  ;;  %s2180_s24 = int_to_ptr.vmem [resolvable:$true] %s1427_s24 }
 0x72e   : > { %s1766_s16 = scalar_lea.vmem %s2180_s24, 128 }
 0x72f   : > { %p1767_p11 = scmp.ne.s32.totalorder %s2180_s24, %s1766_s16 }
 0x731   : > { %p1768_p12 = pnand %p1767_p11, %p1952_p5 }
 0x733   : > { %p1769_p13 = pneg %p1768_p12 }
 0x744   : > { %v864_v46 = vpop.f32.mrb[4].mxu0 }
 0x745   : > { %v870_v47 = vadd.f32 %v864_v46, %v709_v45  ;;  %v1614_v48 = vpop.f32.mrb[5].mxu0  ;;  %v1736_v45 = vld [vmem:[%s2232_s11] sm:$0xff]  }
 0x746   : > { %v867_v49 = vpop.f32.mrb[6].mxu0 }
 0x747   : > { %v1615_v50 = vpop.f32.mrb[7].mxu0 }
 0x748   : > { %v1514_v50 = vld [vmem:[%s2228_s7] ss:$0 sm:$0xff] }
 0x7a5   : > { %v930_v51 = vpop.xlane.xlu1 %929 }
 0x7a6   : > { %1756 = vrcp.f32 %v930_v51 }
 0x7a9   : > { %v1035_v54 = vpop.permute.xlu1 %1034 }
 0x7aa   : > { %v1040_v56 = vsel %vm552_vm2, %v1035_v54, 0 }
 0x7ad   : > { %v1033_v57 = vpop.permute.xlu1 %1032 }
 0x7b0   : > { %v1757_v52 = vpop.eup %1756 }
 0x7b1   : > { %v932_v53 = vmul.f32 %v1757_v52, %v1755_v42  ;;  %v1515_v52 = vld [vmem:[%s2229_s8] ss:$0 sm:$0xff] }
 0x7b3   : > { %v933_v55 = vpack.c.bf16 %v932_v53, %v932_v53 }
 0x7b5   : > { %1625 = vmatmul.mubr.msk.bf16.vlgmr.msra.gmra.mrb[8].mxu0 %vm552_vm2, %v933_v55 }
 0x7b6   : > { %1635 = vmatpush3.bf16.xpose.msra.mxu0 %v1040_v56  ;;  %1636 = vmatprep.mubr.msk.bf16.mxu0 %vm1831_vm1, %v1830_v8  ;;  %v1737_v56 = vld [vmem:[%s2232_s11 + $0x8] sm:$0xff]  }
 0x7b7   : > { %1646 = vmatprep.subr.bf16.mxu0 %v1830_v8 }
 0x7bd   : > { %1637 = vmatmul.mubr.msk.bf16.vlgmr.msra.gmra.mrb[12].mxu0 %vm552_vm2, %v1033_v57  ;;  %v1738_v57 = vld [vmem:[%s2232_s11 + $0x10] sm:$0xff]  }
 0x7be   : > { %1648 = vmatprep.mubr.msk.bf16.mxu0 %vm1831_vm1, %v1830_v8 }
 0x888   : > { %v976_v60 = vpop.f32.mrb[8].mxu0 }
 0x889   : > { %v982_v61 = vpack.c.bf16 %v976_v60, %v976_v60  ;;  %v1626_v62 = vpop.f32.mrb[9].mxu0  ;;  %v1741_v60 = vld [vmem:[%s2232_s11 + $0x28] sm:$0xff]  }
 0x88a   : > { %v979_v63 = vpop.f32.mrb[10].mxu0  ;;  %v1743_v62 = vld [vmem:[%s2232_s11 + $0x38] sm:$0xff]  }
 0x88b   : > { %v1627_v1 = vpop.f32.mrb[11].mxu0  ;;  %1631 = vmatmul.mubr.msk.bf16.vlgmr.msra.gmra.mrb[24].mxu1 %vm552_vm2, %v982_v61  ;;  %v1742_v61 = vld [vmem:[%s2232_s11 + $0x30] sm:$0xff]   ;;  %v1516_v63 = vld [vmem:[%s2231_s10] ss:$0 sm:$0xff] }
 0x88c   : > { %1642 = vmatprep.mubr.msk.bf16.mxu1 %vm1831_vm1, %v1830_v8 }
 0x890   : > { %v1076_v2 = vpop.f32.mrb[12].mxu0 }
 0x891   : > { %v1082_v3 = vsel %vm540_vm3, %v1076_v2, -inf  ;;  %v1638_v4 = vpop.f32.mrb[13].mxu0 }
 0x892   : > { %v1079_v5 = vpop.f32.mrb[14].mxu0  ;;  %v1083_v6 = vsel %vm552_vm2, %v1082_v3, -inf }
 0x893   : > { %1084 = vmax.xlane.f32.xlu0 %v1083_v6  ;;  %v1639_v7 = vpop.f32.mrb[15].mxu0 }
 0x8a9   : > { %1095 = vrot.lane.b32.xlu0 %v1999_v25, %s1842_s21  ;;  %v1150_v25 = vsel %vm617_vm4, %v1512_v14, 0  ;;  %v1520_v14 = vld [vmem:[%s2233_s12] ss:$0 sm:$0xff]  ;;  %s1770_s21 = sshll.u32 %s1843_s20, 4  ;;  %s1771_s21 = int_to_ptr.vmem [resolvable:$false] %s1770_s21 }
 0x8aa   : > { %1647 = vmatpush3.bf16.msra.mxu0 %v1150_v25  ;;  %s1772_s2 = scalar_lea.vmem %s1771_s21, 256  ;;  %p1773_p0 = scmp.lt.s32.totalorder %s2180_s24, %s1771_s21 }
 0x8ab   : > { %1660 = vmatprep.subr.bf16.mxu0 %v1830_v8  ;;  %p1774_p1 = scmp.lt.s32.totalorder %s1772_s2, %s1766_s16 }
 0x8ad   : > { %p1775_p2 = por %p1774_p1, %p1773_p0 }
 0x8af   : > { %p1776_p3 = pnand %p1775_p2, %p1769_p13 }
 0x920   : > { %v1085_v9 = vpop.xlane.xlu0 %1084 }
 0x921   : > { %v1086_v10 = vsub.f32 %v1082_v3, %v1085_v9 }
 0x923   : > { %v1087_v11 = vmul.f32 1.442695, %v1086_v10 }
 0x924   : > { %v1096_v12 = vpop.permute.xlu0 %1095 }
 0x925   : > { %1758 = vpow2.f32 %v1087_v11  ;;  %v1101_v13 = vsel %vm617_vm4, %v1096_v12, 0 }
 0x926   : > { %1641 = vmatpush3.bf16.msra.mxu1 %v1101_v13 }
 0x927   : > { %1652 = vmatprep.subr.bf16.mxu1 %v1830_v8 }
 0x92f   : > { %v1759_v33 = vpop.eup %1758 }
 0x930   : > { %v1089_v34 = vsel %vm552_vm2, %v1759_v33, 0.0 }
 0x931   : > { %1090 = vadd.xlane.f32.xlu1 %v1089_v34 }
 0x95e   : > { %v1025_v15 = vpop.f32.mrb[24].mxu1 }
 0x95f   : > { %v1031_v16 = vadd.f32 %v1025_v15, %v870_v47  ;;  %v1632_v17 = vpop.f32.mrb[25].mxu1 }
 0x960   : > { %v1028_v18 = vpop.f32.mrb[26].mxu1 }
 0x961   : > { %v1633_v19 = vpop.f32.mrb[27].mxu1 }
 0x9be   : > { %v1091_v20 = vpop.xlane.xlu1 %1090 }
 0x9bf   : > { %1760 = vrcp.f32 %v1091_v20 }
 0x9c9   : > { %v1761_v21 = vpop.eup %1760 }
 0x9ca   : > { %v1093_v22 = vmul.f32 %v1761_v21, %v1759_v33 }
 0x9cc   : > { %v1094_v23 = vpack.c.bf16 %v1093_v22, %v1093_v22 }
 0x9ce   : > { %1643 = vmatmul.mubr.msk.bf16.vlgmr.msra.gmra.mrb[28].mxu1 %vm552_vm2, %v1094_v23 }
 0x9cf   : > { %1656 = vmatprep.mubr.msk.bf16.mxu1 %vm1831_vm1, %v1830_v8  ;;  %1653 = vmatpush3.bf16.msra.mxu1 %v1734_v44 }
 0x9d0   : > { %1654 = vmatprep.subr.bf16.mxu1 %v1830_v8 }
 0xaa1   : > { %v1137_v24 = vpop.f32.mrb[28].mxu1 }
 0xaa2   : > { %v1143_v26 = vpack.c.bf16 %v1137_v24, %v1137_v24  ;;  %v1644_v27 = vpop.f32.mrb[29].mxu1 }
 0xaa3   : > { %v1140_v28 = vpop.f32.mrb[30].mxu1 }
 0xaa4   : > { %v1645_v29 = vpop.f32.mrb[31].mxu1  ;;  %1649 = vmatmul.mubr.msk.bf16.vlgmr.msra.gmra.mrb[16].mxu0 %vm552_vm2, %v1143_v26 }
 0xaa5   : > { %1676 = vmatprep.mubr.msk.bf16.mxu0 %vm1831_vm1, %v1830_v8  ;;  %1661 = vmatpush3.bf16.msra.mxu0 %v1736_v45 }
 0xaa6   : > { %1662 = vmatprep.subr.bf16.mxu0 %v1830_v8 }
 0xaa9   : > { %1663 = vmatpush3.bf16.msra.mxu0 %v1737_v56 }
 0xaaa   : > { %1664 = vmatprep.subr.bf16.mxu0 %v1830_v8 }
 0xaad   : > { %1665 = vmatpush3.bf16.msra.mxu0 %v1738_v57 }
 0xaae   : > { %1666 = vmatprep.subr.bf16.mxu0 %v1830_v8 }
 0xab1   : > { %1667 = vmatpush3.bf16.msra.mxu0 %v1739_v58 }
 0xab2   : > { %1668 = vmatprep.subr.bf16.mxu0 %v1830_v8 }
 0xab5   : > { %1669 = vmatpush3.bf16.msra.mxu0 %v1740_v59 }
 0xab6   : > { %1670 = vmatprep.subr.bf16.mxu0 %v1830_v8 }
 0xab9   : > { %1671 = vmatpush3.bf16.msra.mxu0 %v1741_v60 }
 0xaba   : > { %1672 = vmatprep.subr.bf16.mxu0 %v1830_v8 }
 0xabd   : > { %1673 = vmatpush3.bf16.msra.mxu0 %v1742_v61 }
 0xabe   : > { %1674 = vmatprep.subr.bf16.mxu0 %v1830_v8 }
 0xac1   : > { %1675 = vmatpush3.bf16.msra.mxu0 %v1743_v62 }
 0xb77   : > { %v1186_v30 = vpop.f32.mrb[16].mxu0 }
 0xb78   : > { %v1192_v31 = vadd.f32 %v1186_v30, %v1031_v16  ;;  %v1650_v32 = vpop.f32.mrb[17].mxu0 }
 0xb79   : > { %v1189_v35 = vpop.f32.mrb[18].mxu0 }
 0xb7a   : > { %v2115_v36 = vadd.f32 %v1192_v31, %v1967_v0  ;;  %v1651_v37 = vpop.f32.mrb[19].mxu0  ;;  %v1735_v0 = vld [vmem:[%s2230_s9 + $0x8] sm:$0xff]  }
 0xb7b   : > { %1655 = vmatpush3.bf16.msra.mxu1 %v1735_v0 }
 0xb7c   : > { %v1196_v38 = vsel %vm440_vm0, %v2115_v36, 0.0 }
 0xb7d   : > { %1197 = vadd.xlane.f32.xlu0 %v1196_v38 }
 0xc0a   : > { %v1198_v39 = vpop.xlane.xlu0 %1197 }
 0xc0b   : > { %v1199_v40 = vmul.f32 0.03125, %v1198_v39 }
 0xc0d   : > { %v1200_v41 = vsub.f32 %v2115_v36, %v1199_v40 }
 0xc0f   : > { %v1201_v42 = vmul.f32 %v1200_v41, %v1200_v41 }
 0xc11   : > { %v1202_v43 = vsel %vm440_vm0, %v1201_v42, 0.0 }
 0xc12   : > { %1203 = vadd.xlane.f32.xlu1 %v1202_v43 }
 0xc9f   : > { %v1204_v46 = vpop.xlane.xlu1 %1203 }
 0xca0   : > { %v1205_v47 = vmul.f32 0.03125, %v1204_v46 }
 0xca2   : > { %v1206_v48 = vadd.f32 1e-05, %v1205_v47 }
 0xca4   : > { %1762 = vrsqrt.f32 %v1206_v48 }
 0xcae   : > { %v1763_v49 = vpop.eup %1762 }
 0xcaf   : > { %v1208_v51 = vmul.f32 %v1763_v49, %v1200_v41 }
 0xcb1   : > { %v1215_v53 = vmul.f32 %v1514_v50, %v1208_v51 }
 0xcb3   : > { %v1222_v54 = vadd.f32 %v1515_v52, %v1215_v53 }
 0xcb5   : > { %v1223_v55 = vpack.c.bf16 %v1222_v54, %v1222_v54 }
 0xcb7   : > { %1657 = vmatmul.mubr.msk.bf16.vlgmr.msra.gmra.mrb[32].mxu1 %vm440_vm0, %v1223_v55 }
 0xd8a   : > { %v1284_v1 = vpop.f32.mrb[32].mxu1 }
 0xd8b   : > { %v1285_v2 = vadd.f32 %v1516_v63, %v1284_v1  ;;  %v1658_v3 = vpop.f32.mrb[33].mxu1 }
 0xd8c   : > { %v1287_v4 = vpop.f32.mrb[34].mxu1 }
 0xd8d   : > { %v1291_v5 = vmul.f32 0.044715, %v1285_v2  ;;  %v1659_v6 = vpop.f32.mrb[35].mxu1  ;;  %v1290_v8 = vmul.f32 0.5, %v1285_v2 }
 0xd8f   : > { %v1292_v7 = vmul.f32 %v1291_v5, %v1285_v2 }
 0xd91   : > { %v1293_v9 = vmul.f32 %v1292_v7, %v1285_v2 }
 0xd93   : > { %v1294_v10 = vadd.f32 %v1293_v9, %v1285_v2 }
 0xd95   : > { %v1295_v11 = vmul.f32 0.7978846, %v1294_v10 }
 0xd97   : > { %1764 = vtanh.f32 %v1295_v11 }
 0xda1   : > { %v1765_v12 = vpop.eup %1764 }
 0xda2   : > { %v1297_v13 = vadd.f32 1.0, %v1765_v12 }
 0xda4   : > { %v1298_v33 = vmul.f32 %v1297_v13, %v1290_v8 }
 0xda6   : > { %v1299_v34 = vpack.c.bf16 %v1298_v33, %v1298_v33 }
 0xda8   : > { %1677 = vmatmul.mubr.bf16.vlgmr.msra.gmra.mrb[20].mxu0 %v1299_v34 }
 0xe7b   : > { %v1405_v25 = vpop.f32.mrb[20].mxu0 }
 0xe7c   : > { %v1406_v15 = vadd.f32 %v1520_v14, %v1405_v25  ;;  %v1678_v16 = vpop.f32.mrb[21].mxu0 }
 0xe7d   : > { %v1408_v17 = vpop.f32.mrb[22].mxu0 }
 0xe7e   : > { %v1411_v18 = vadd.f32 %v1406_v15, %v2115_v36  ;;  %v1679_v19 = vpop.f32.mrb[23].mxu0 }
 0xe80   : > { %1412 = vst.msk [vmem:[%s431_s23] sm:$0xff] %vm440_vm0, %v1411_v18 }
 0xe81   : > { %1779 = shalt.err (!%p1776_p3)
}
 0xe82   : > { %s1780_s0 = scalar_lea.hbm %s2178_s1, 128  ;;  %s1784_s23 = scalar_lea.hbm %s2234_s13, 256 }
 0xe83   : > { %p1781_p4 = scmp.ne.s32.totalorder %s2178_s1, %s1780_s0  ;;  %p1785_p9 = scmp.lt.u32.totalorder %s2178_s1, %s2234_s13 }
 0xe84   : > { %p1786_p10 = scmp.lt.u32.totalorder %s1784_s23, %s1780_s0  ;;  %p1788_p12 = scmp.lt.u32.totalorder %s1780_s0, %s2178_s1 }
 0xe85   : > { %p1782_p7 = pnand %p1781_p4, %p1952_p5 }
 0xe86   : > { %p1787_p11 = por %p1786_p10, %p1785_p9 }
 0xe87   : > { %p1783_p8 = pneg %p1782_p7 }
 0xe88   : > { %p1789_p13 = por %p1788_p12, %p1787_p11 }
 0xe8a   : > { %p1790_p0 = pnand %p1789_p13, %p1783_p8 }
 0xe8c   : > { %1793 = shalt.err (!%p1790_p0)
}
 0xe8d   : > { %1680 = dma.vmem_to_hbm [thread:$0]  (%p1952_p5), %s2180_s24, 128, %s2178_s1, %s1414_s29  }
 0xe8e PF: > { %p1686_p1 = scmp.ge.s32.totalorder %s1828_s28, 2  ;;  %s1439_s2 = sand.u32 1, %s1816_s25  }
 0xe8f   : > { %s1440_s16 = scalar_lea.sflag [#allocation3], %s1439_s2 }
 0xe90   : > { %p1683_p2 = pnand %p1686_p1, %p1956_p6 }
 0xe92   : > { %1811 = dma.done.wait (!%p1683_p2), %s1440_s16, 128  }
 0xe93   : > { %1813 = vsyncadd (!%p1683_p2), %s1440_s16, 4294967168  ;;  %p23_p3 = scmp.ge.s32.totalorder %s1939_s14, 4   ;;  %s2243_s25 = smov %s1820_s26 }
 0xe94   : > { %s2244_s26 = smov %s1824_s27  ;;  %s2245_s27 = smov %s1950_s17 }
 0xe95   : > { %s2246_s28 = smov %s1939_s14  ;;  %25 = sbr.rel (!%p23_p3) target bundleno = 7 (0x7), region = 110 }
 0xe9c   :  { %1445 = vsyncpa [#allocation3], 1 }
 0xe9d   :  { %1447 = vsyncpa [#allocation3 + $0x1], 1 }

// kernel: tpu_custom_call.1
= control target key start
LH: loop header
LB: loop body
LE: loop exit
PB: predicated region body
PF: predicated region fallthrough
CT: control target
= control target key end

     0   :  { %s2221_s0 = inlined_call_operand.vmem [shape: f32[2,8,32], index: 0, kind: input, shape index: {}]   ;;  %s2222_s1 = inlined_call_operand.vmem [shape: f32[1,32], index: 1, kind: input, shape index: {}]   ;;  %s2223_s2 = inlined_call_operand.vmem [shape: f32[1,32], index: 2, kind: input, shape index: {}]   ;;  %s2224_s3 = inlined_call_operand.vmem [shape: bf16[32,96], index: 3, kind: input, shape index: {}]   ;;  %s2225_s4 = inlined_call_operand.vmem [shape: f32[1,96], index: 4, kind: input, shape index: {}]   ;;  %s2226_s5 = inlined_call_operand.vmem [shape: bf16[4,8,32], index: 5, kind: input, shape index: {}]   ;;  %s2227_s6 = inlined_call_operand.vmem [shape: f32[1,32], index: 6, kind: input, shape index: {}]   ;;  %s2228_s7 = inlined_call_operand.vmem [shape: f32[1,32], index: 7, kind: input, shape index: {}]   ;;  %s2229_s8 = inlined_call_operand.vmem [shape: f32[1,32], index: 8, kind: input, shape index: {}]   ;;  %s2230_s9 = inlined_call_operand.vmem [shape: bf16[32,128], index: 9, kind: input, shape index: {}]   ;;  %s2231_s10 = inlined_call_operand.vmem [shape: f32[1,128], index: 10, kind: input, shape index: {}]   ;;  %s2232_s11 = inlined_call_operand.vmem [shape: bf16[128,32], index: 11, kind: input, shape index: {}]   ;;  %s2233_s12 = inlined_call_operand.vmem [shape: f32[1,32], index: 12, kind: input, shape index: {}]   ;;  %s2234_s13 = inlined_call_operand.hbm [shape: f32[2,8,32], index: 13, kind: output, shape index: {}]  }
   0x1   :  { %2235 = sst [smem:[#allocation5_spill]] %s2221_s0 }
   0x2   :  { %2236 = sst [smem:[#allocation6_spill]] %s2222_s1 }
   0x3   :  { %2237 = sst [smem:[#allocation7_spill]] %s2223_s2 }
   0x4   :  { %18 = vsyncpa [#allocation3], 0 }
   0x5   :  { %20 = vsyncpa [#allocation3 + $0x1], 0  ;;  %s1914_s25 = smov 0   ;;  %s1916_s26 = smov 0  }
   0x6   :  { %s1918_s27 = smov 0   ;;  %s1920_s28 = smov 0  }
   0x7 LB: > { %s1935_s29 = sadd.s32 4294967295, %s1828_s28   ;;  %s1486_s30 = sadd.s32 4294967294, %s1828_s28   ;;  %s1828_s28 = sphi %s1920_s28, %s2246_s28   ;;  %s1824_s27 = sphi %s1918_s27, %s2245_s27   ;;  %s1820_s26 = sphi %s1916_s26, %s2244_s26   ;;  %s1816_s25 = sphi %s1914_s25, %s2243_s25  }
   0x8   : > { %s1939_s14 = sadd.s32 1, %s1828_s28   ;;  %s311_s15 = sadd.s32 1, %s1824_s27 }
   0x9   : > { %s308_s16 = ssub.s32 %s1828_s28, %s1939_s14  ;;  %p321_p0 = scmp.ne.s32.totalorder %s1824_s27, %s1820_s26 }
   0xa   : > { %p309_p1 = scmp.eq.s32.totalorder %s308_s16, 0  ;;  %p322_p2 = scmp.eq.s32.totalorder %s1935_s29, 1 }
   0xb   : > { %p327_p3 = scmp.ne.s32.totalorder %s1820_s26, %s1816_s25  ;;  %p328_p4 = scmp.eq.s32.totalorder %s1486_s30, 1 }
   0xc   : > { %s1950_s17 = scalar_select %p309_p1, %s1824_s27, %s311_s15  }
   0xd   : > { %p1952_p5 = por %p322_p2, %p321_p0  ;;  %p1956_p6 = por %p328_p4, %p327_p3 }
   0xe   : > { %p1489_p7 = scmp.ge.s32.totalorder %s1828_s28, 1  ;;  %p389_p8 = scmp.lt.s32.totalorder %s1828_s28, 3 }
  0x10   : > { %p390_p9 = pnand %p1489_p7, %p389_p8 }
  0x11   : > { %p432_p10 = scmp.lt.s32.totalorder (!%p390_p9), %s1935_s29, 1  ;;  %vm440_vm0 = vcmask (!%p390_p9), 261120   ;;  %s2240_s0 = sld [smem:[#allocation5_spill]] (!%p390_p9)  ;;  %v1732_v7 = vld [vmem:[%s2224_s3] sm:$0xff] (!%p390_p9)   ;;  %v1830_v8 = vmov (!%p390_p9), 0.0   ;;  %vm1831_vm1 = vmmov (!%p390_p9), 0   ;;  %v536_v32 = vlaneseq (!%p390_p9) }
  0x12   : > { %393 = sbr.rel (%p390_p9) target bundleno = 3726 (0xe8e), region = 72  ;;  %1572 = vmatprep.subr.bf16.mxu1 (!%p390_p9), %v1830_v8  ;;  %1576 = vmatprep.mubr.msk.bf16.mxu1 (!%p390_p9), %vm1831_vm1, %v1830_v8  ;;  %v1733_v9 = vld [vmem:[%s2224_s3 + $0x8] sm:$0xff] (!%p390_p9)   ;;  %s2241_s1 = sld [smem:[#allocation6_spill]] (!%p390_p9)  ;;  %v1494_v20 = vld [vmem:[%s2225_s4] ss:$0 sm:$0xff] (!%p390_p9)  ;;  %vm552_vm2 = vcmask (!%p390_p9), 64512  }
  0x13   : > { %1573 = vmatpush3.bf16.msra.mxu1 (!%p390_p9), %v1732_v7  ;;  %1598 = vmatprep.subr.bf16.mxu0 (!%p390_p9), %v1830_v8  ;;  %s2242_s2 = sld [smem:[#allocation7_spill]] (!%p390_p9)  ;;  %s1832_s16 = smov (!%p390_p9), 120   ;;  %v2015_v33 = vshrl.u32 (!%p390_p9), %v536_v32, 7  ;;  %v2017_v34 = vand.u32 (!%p390_p9), 127, %v536_v32  ;;  %vm617_vm4 = vcmask (!%p390_p9), 1043456  }
  0x14   : > { %1574 = vmatprep.subr.bf16.mxu1 (!%p390_p9), %v1830_v8  ;;  %1600 = vmatprep.mubr.msk.bf16.mxu0 (!%p390_p9), %vm1831_vm1, %v1830_v8  ;;  %s1835_s22 = smov (!%p390_p9), 64   ;;  %s1836_s23 = smov (!%p390_p9), 56   ;;  %v662_v63 = vld [vmem:[%s2226_s5] sm:$0xf] (!%p390_p9) }
  0x15   : > { %vm540_vm3 = vcmp.le.s32.totalorder (!%p390_p9), %v2017_v34, %v2015_v33  ;;  %s1838_s30 = smov (!%p390_p9), 112   ;;  %s1839_s15 = smov (!%p390_p9), 48  }
  0x17   : > { %1575 = vmatpush3.bf16.msra.mxu1 (!%p390_p9), %v1733_v9 }
  0x18   : > { %1580 = vmatprep.subr.bf16.mxu1 (!%p390_p9), %v1830_v8  ;;  %v1492_v14 = vld [vmem:[%s2241_s1] ss:$0 sm:$0xff] (!%p390_p9) }
  0x19   : > { %s433_s20 = scalar_select %p432_p10, %s1935_s29, 1  ;;  %v1493_v16 = vld [vmem:[%s2242_s2] ss:$0 sm:$0xff] }
  0x1b   : > { %s1491_s21 = sshll.u32 %s433_s20, 3  ;;  %s1833_s20 = smov 96  }
  0x1c   : > { %s435_s24 = scalar_lea.vmem %s2240_s0, %s1491_s21  ;;  %s1834_s21 = smov 88  }
  0x1d   : > { %v1967_v0 = vld [vmem:[%s435_s24] sm:$0xff]  ;;  %s1837_s24 = smov 80  }
  0x1e   : > { %v441_v1 = vsel %vm440_vm0, %v1967_v0, 0.0 }
  0x1f   : > { %442 = vadd.xlane.f32.xlu0 %v441_v1  ;;  %v667_v1 = vsel %vm617_vm4, %v662_v63, 0 }
  0xac   : > { %v443_v2 = vpop.xlane.xlu0 %442 }
  0xad   : > { %v445_v3 = vmul.f32 0.03125, %v443_v2 }
  0xaf   : > { %v446_v4 = vsub.f32 %v1967_v0, %v445_v3 }
  0xb1   : > { %v447_v5 = vmul.f32 %v446_v4, %v446_v4 }
  0xb3   : > { %v448_v6 = vsel %vm440_vm0, %v447_v5, 0.0 }
  0xb4   : > { %449 = vadd.xlane.f32.xlu0 %v448_v6 }
 0x141   : > { %v450_v10 = vpop.xlane.xlu0 %449 }
 0x142   : > { %v451_v11 = vmul.f32 0.03125, %v450_v10 }
 0x144   : > { %v452_v12 = vadd.f32 1e-05, %v451_v11 }
 0x146   : > { %1744 = vrsqrt.f32 %v452_v12 }
 0x150   : > { %v1745_v13 = vpop.eup %1744 }
 0x151   : > { %v454_v15 = vmul.f32 %v1745_v13, %v446_v4 }
 0x153   : > { %v461_v17 = vmul.f32 %v1492_v14, %v454_v15 }
 0x155   : > { %v468_v18 = vadd.f32 %v1493_v16, %v461_v17  ;;  %v1504_v17 = vld [vmem:[%s2226_s5 + $0x4] sm:$0xf] }
 0x157   : > { %v469_v19 = vpack.c.bf16 %v468_v18, %v468_v18  ;;  %v828_v18 = vsel %vm617_vm4, %v1504_v17, 0 }
 0x159   : > { %1577 = vmatmul.mubr.msk.bf16.vlgmr.msra.gmra.mrb[0].mxu1 %vm440_vm0, %v469_v19 }
 0x15a   : > { %1582 = vmatprep.mubr.msk.bf16.mxu1 %vm1831_vm1, %v1830_v8 }
 0x22c   : > { %v530_v21 = vpop.f32.mrb[0].mxu1 }
 0x22d   : > { %v531_v22 = vadd.f32 %v1494_v20, %v530_v21  ;;  %v1578_v23 = vpop.f32.mrb[1].mxu1 }
 0x22e   : > { %v533_v24 = vpop.f32.mrb[2].mxu1 }
 0x22f   : > { %v1999_v25 = vpack.c.bf16 %v531_v22, %v531_v22  ;;  %v1579_v26 = vpop.f32.mrb[3].mxu1 }
 0x231   : > { %710 = vrot.lane.b32.xlu0 %v1999_v25, %s1832_s16  ;;  %550 = vrot.lane.b32.xlu1 %v1999_v25, %s1833_s20  ;;  %s1843_s20 = smov [#allocation2]  }
 0x235   : > { %712 = vrot.lane.b32.xlu1 %v1999_v25, %s1834_s21  ;;  %s1842_s21 = smov 40  }
 0x2a3   : > { %v551_v27 = vpop.permute.xlu1 %550  ;;  %v711_v31 = vpop.permute.xlu0 %710 }
 0x2a4   : > { %v557_v28 = vsel %vm552_vm2, %v551_v27, 0 }
 0x2a5   : > { %1581 = vmatpush3.bf16.xpose.msra.mxu1 %v557_v28 }
 0x2a6   : > { %1586 = vmatprep.subr.bf16.mxu1 %v1830_v8 }
 0x2a7   : > { %v713_v29 = vpop.permute.xlu1 %712 }
 0x2a8   : > { %v718_v30 = vsel %vm552_vm2, %v713_v29, 0 }
 0x2a9   : > { %1599 = vmatpush3.bf16.xpose.msra.mxu0 %v718_v30 }
 0x2aa   : > { %1610 = vmatprep.subr.bf16.mxu0 %v1830_v8 }
 0x2ac   : > { %1583 = vmatmul.mubr.msk.bf16.vlgmr.msra.gmra.mrb[4].mxu1 %vm552_vm2, %v1999_v25 }
 0x2ad   : > { %1588 = vmatprep.mubr.msk.bf16.mxu1 %vm1831_vm1, %v1830_v8 }
 0x2b0   : > { %1601 = vmatmul.mubr.msk.bf16.vlgmr.msra.gmra.mrb[0].mxu0 %vm552_vm2, %v711_v31 }
 0x2b1   : > { %1612 = vmatprep.mubr.msk.bf16.mxu0 %vm1831_vm1, %v1830_v8  ;;  %1611 = vmatpush3.bf16.msra.mxu0 %v828_v18 }
 0x2b2   : > { %1622 = vmatprep.subr.bf16.mxu0 %v1830_v8 }
 0x37f   : > { %v593_v35 = vpop.f32.mrb[4].mxu1 }
 0x380   : > { %v599_v36 = vsel %vm540_vm3, %v593_v35, -inf  ;;  %v1584_v37 = vpop.f32.mrb[5].mxu1 }
 0x381   : > { %v596_v38 = vpop.f32.mrb[6].mxu1  ;;  %v600_v39 = vsel %vm552_vm2, %v599_v36, -inf }
 0x382   : > { %601 = vmax.xlane.f32.xlu1 %v600_v39  ;;  %v1585_v40 = vpop.f32.mrb[7].mxu1 }
 0x383   : > { %v754_v41 = vpop.f32.mrb[0].mxu0 }
 0x384   : > { %v1602_v42 = vpop.f32.mrb[1].mxu0  ;;  %v760_v52 = vsel %vm540_vm3, %v754_v41, -inf }
 0x385   : > { %v757_v43 = vpop.f32.mrb[2].mxu0  ;;  %v761_v53 = vsel %vm552_vm2, %v760_v52, -inf }
 0x386   : > { %v1603_v44 = vpop.f32.mrb[3].mxu0 }
 0x387   : > { %v1498_v44 = vld [vmem:[%s2227_s6] ss:$0 sm:$0xff] }
 0x393   : > { %612 = vrot.lane.b32.xlu1 %v1999_v25, %s1835_s22  ;;  %s1530_s22 = sshll.u32 %s1935_s29, 7 }
 0x394   : > { %s2178_s1 = scalar_lea.hbm %s2234_s13, %s1530_s22 }
 0x40f   : > { %v602_v45 = vpop.xlane.xlu1 %601 }
 0x410   : > { %v603_v46 = vsub.f32 %v599_v36, %v602_v45 }
 0x412   : > { %v604_v47 = vmul.f32 1.442695, %v603_v46 }
 0x413   : > { %v613_v48 = vpop.permute.xlu1 %612 }
 0x414   : > { %1746 = vpow2.f32 %v604_v47  ;;  %v619_v49 = vsel %vm617_vm4, %v613_v48, 0 }
 0x415   : > { %1587 = vmatpush3.bf16.msra.mxu1 %v619_v49 }
 0x416   : > { %1592 = vmatprep.subr.bf16.mxu1 %v1830_v8 }
 0x41e   : > { %v1747_v50 = vpop.eup %1746 }
 0x41f   : > { %v606_v51 = vsel %vm552_vm2, %v1747_v50, 0.0 }
 0x420   : > { %607 = vadd.xlane.f32.xlu0 %v606_v51 }
 0x424   : > { %762 = vmax.xlane.f32.xlu0 %v761_v53 }
 0x43a   : > { %773 = vrot.lane.b32.xlu0 %v1999_v25, %s1836_s23  ;;  %s1840_s23 = smov 72  }
 0x43e   : > { %873 = vrot.lane.b32.xlu0 %v1999_v25, %s1837_s24  ;;  %s1841_s24 = smov 104  }
 0x442   : > { %871 = vrot.lane.b32.xlu0 %v1999_v25, %s1838_s30 }
 0x4ad   : > { %v608_v54 = vpop.xlane.xlu0 %607 }
 0x4ae   : > { %1748 = vrcp.f32 %v608_v54 }
 0x4b1   : > { %v763_v55 = vpop.xlane.xlu0 %762 }
 0x4b2   : > { %v764_v56 = vsub.f32 %v760_v52, %v763_v55 }
 0x4b4   : > { %v765_v57 = vmul.f32 1.442695, %v764_v56 }
 0x4b5   : > { %v774_v3 = vpop.permute.xlu0 %773 }
 0x4b6   : > { %1750 = vpow2.f32 %v765_v57  ;;  %v779_v10 = vsel %vm617_vm4, %v774_v3, 0 }
 0x4b8   : > { %v1749_v58 = vpop.eup %1748 }
 0x4b9   : > { %v610_v59 = vmul.f32 %v1749_v58, %v1747_v50  ;;  %v874_v13 = vpop.permute.xlu0 %873  ;;  %v1508_v58 = vld [vmem:[%s2226_s5 + $0x8] sm:$0xf] }
 0x4ba   : > { %v879_v15 = vsel %vm552_vm2, %v874_v13, 0 }
 0x4bb   : > { %v611_v60 = vpack.c.bf16 %v610_v59, %v610_v59  ;;  %v989_v59 = vsel %vm617_vm4, %v1508_v58, 0  ;;  %v1739_v58 = vld [vmem:[%s2232_s11 + $0x18] sm:$0xff]  }
 0x4bd   : > { %1589 = vmatmul.mubr.msk.bf16.vlgmr.msra.gmra.mrb[8].mxu1 %vm552_vm2, %v611_v60  ;;  %v872_v16 = vpop.permute.xlu0 %871 }
 0x4be   : > { %1594 = vmatprep.mubr.msk.bf16.mxu1 %vm1831_vm1, %v1830_v8  ;;  %1593 = vmatpush3.bf16.msra.mxu1 %v667_v1 }
 0x4bf   : > { %1604 = vmatprep.subr.bf16.mxu1 %v1830_v8 }
 0x4c0   : > { %v1751_v61 = vpop.eup %1750 }
 0x4c1   : > { %v767_v62 = vsel %vm552_vm2, %v1751_v61, 0.0 }
 0x4c2   : > { %768 = vadd.xlane.f32.xlu1 %v767_v62 }
 0x4d3   : > { %934 = vrot.lane.b32.xlu1 %v1999_v25, %s1839_s15  ;;  %s429_s15 = sand.u32 1, %s1820_s26  }
 0x4d4   : > { %s1490_s16 = sshll.u32 %s429_s15, 3  ;;  %s1414_s29 = scalar_lea.sflag [#allocation3], %s429_s15 }
 0x54f   : > { %v769_v2 = vpop.xlane.xlu1 %768 }
 0x550   : > { %1752 = vrcp.f32 %v769_v2 }
 0x553   : > { %v935_v23 = vpop.permute.xlu1 %934 }
 0x554   : > { %v940_v29 = vsel %vm617_vm4, %v935_v23, 0 }
 0x55a   : > { %v1753_v7 = vpop.eup %1752 }
 0x55b   : > { %v771_v12 = vmul.f32 %v1753_v7, %v1751_v61 }
 0x55d   : > { %v772_v14 = vpack.c.bf16 %v771_v12, %v771_v12 }
 0x590   : > { %v655_v4 = vpop.f32.mrb[8].mxu1 }
 0x591   : > { %v661_v5 = vpack.c.bf16 %v655_v4, %v655_v4  ;;  %v1590_v6 = vpop.f32.mrb[9].mxu1 }
 0x592   : > { %v658_v9 = vpop.f32.mrb[10].mxu1 }
 0x593   : > { %v1591_v11 = vpop.f32.mrb[11].mxu1  ;;  %1595 = vmatmul.mubr.msk.bf16.vlgmr.msra.gmra.mrb[12].mxu1 %vm552_vm2, %v661_v5 }
 0x594   : > { %1605 = vmatpush3.bf16.msra.mxu1 %v779_v10  ;;  %1606 = vmatprep.mubr.msk.bf16.mxu1 %vm1831_vm1, %v1830_v8 }
 0x595   : > { %1616 = vmatprep.subr.bf16.mxu1 %v1830_v8 }
 0x59b   : > { %1607 = vmatmul.mubr.msk.bf16.vlgmr.msra.gmra.mrb[16].mxu1 %vm552_vm2, %v772_v14  ;;  %v1512_v14 = vld [vmem:[%s2226_s5 + $0xc] sm:$0xf] }
 0x59c   : > { %1618 = vmatprep.mubr.msk.bf16.mxu1 %vm1831_vm1, %v1830_v8 }
 0x59d   : > { %1617 = vmatpush3.bf16.xpose.msra.mxu1 %v879_v15 }
 0x59e   : > { %1628 = vmatprep.subr.bf16.mxu1 %v1830_v8 }
 0x5a4   : > { %1619 = vmatmul.mubr.msk.bf16.vlgmr.msra.gmra.mrb[20].mxu1 %vm552_vm2, %v872_v16 }
 0x5a5   : > { %1630 = vmatprep.mubr.msk.bf16.mxu1 %vm1831_vm1, %v1830_v8  ;;  %1629 = vmatpush3.bf16.msra.mxu1 %v989_v59  ;;  %v1740_v59 = vld [vmem:[%s2232_s11 + $0x20] sm:$0xff]  }
 0x5a6   : > { %1640 = vmatprep.subr.bf16.mxu1 %v1830_v8 }
 0x666   : > { %v703_v19 = vpop.f32.mrb[12].mxu1 }
 0x667   : > { %v1596_v20 = vpop.f32.mrb[13].mxu1  ;;  %v709_v45 = vadd.f32 %v1498_v44, %v703_v19  ;;  %v1734_v44 = vld [vmem:[%s2230_s9] sm:$0xff]  }
 0x668   : > { %v706_v21 = vpop.f32.mrb[14].mxu1 }
 0x669   : > { %v1597_v22 = vpop.f32.mrb[15].mxu1 }
 0x66e   : > { %v815_v24 = vpop.f32.mrb[16].mxu1 }
 0x66f   : > { %v821_v26 = vpack.c.bf16 %v815_v24, %v815_v24  ;;  %v1608_v27 = vpop.f32.mrb[17].mxu1 }
 0x670   : > { %v818_v28 = vpop.f32.mrb[18].mxu1 }
 0x671   : > { %v1609_v30 = vpop.f32.mrb[19].mxu1  ;;  %1613 = vmatmul.mubr.msk.bf16.vlgmr.msra.gmra.mrb[4].mxu0 %vm552_vm2, %v821_v26 }
 0x672   : > { %1623 = vmatpush3.bf16.msra.mxu0 %v940_v29  ;;  %1624 = vmatprep.mubr.msk.bf16.mxu0 %vm1831_vm1, %v1830_v8 }
 0x673   : > { %1634 = vmatprep.subr.bf16.mxu0 %v1830_v8 }
 0x677   : > { %v915_v31 = vpop.f32.mrb[20].mxu1 }
 0x678   : > { %v921_v32 = vsel %vm540_vm3, %v915_v31, -inf  ;;  %v1620_v35 = vpop.f32.mrb[21].mxu1 }
 0x679   : > { %v918_v36 = vpop.f32.mrb[22].mxu1  ;;  %v922_v37 = vsel %vm552_vm2, %v921_v32, -inf }
 0x67a   : > { %923 = vmax.xlane.f32.xlu0 %v922_v37  ;;  %v1621_v38 = vpop.f32.mrb[23].mxu1 }
 0x707   : > { %v924_v39 = vpop.xlane.xlu0 %923 }
 0x708   : > { %v925_v40 = vsub.f32 %v921_v32, %v924_v39 }
 0x70a   : > { %v926_v41 = vmul.f32 1.442695, %v925_v40 }
 0x70c   : > { %1754 = vpow2.f32 %v926_v41 }
 0x716   : > { %v1755_v42 = vpop.eup %1754 }
 0x717   : > { %v928_v43 = vsel %vm552_vm2, %v1755_v42, 0.0 }
 0x718   : > { %929 = vadd.xlane.f32.xlu1 %v928_v43 }
 0x729   : > { %1034 = vrot.lane.b32.xlu1 %v1999_v25, %s1840_s23  ;;  %s431_s23 = scalar_lea.vmem [#allocation2], %s1490_s16 }
 0x72d   : > { %1032 = vrot.lane.b32.xlu1 %v1999_v25, %s1841_s24  ;;  %s1427_s24 = sshll.u32 %s431_s23, 4  ;;  %s2180_s24 = int_to_ptr.vmem [resolvable:$true] %s1427_s24 }
 0x72e   : > { %s1766_s16 = scalar_lea.vmem %s2180_s24, 128 }
 0x72f   : > { %p1767_p11 = scmp.ne.s32.totalorder %s2180_s24, %s1766_s16 }
 0x731   : > { %p1768_p12 = pnand %p1767_p11, %p1952_p5 }
 0x733   : > { %p1769_p13 = pneg %p1768_p12 }
 0x744   : > { %v864_v46 = vpop.f32.mrb[4].mxu0 }
 0x745   : > { %v870_v47 = vadd.f32 %v864_v46, %v709_v45  ;;  %v1614_v48 = vpop.f32.mrb[5].mxu0  ;;  %v1736_v45 = vld [vmem:[%s2232_s11] sm:$0xff]  }
 0x746   : > { %v867_v49 = vpop.f32.mrb[6].mxu0 }
 0x747   : > { %v1615_v50 = vpop.f32.mrb[7].mxu0 }
 0x748   : > { %v1514_v50 = vld [vmem:[%s2228_s7] ss:$0 sm:$0xff] }
 0x7a5   : > { %v930_v51 = vpop.xlane.xlu1 %929 }
 0x7a6   : > { %1756 = vrcp.f32 %v930_v51 }
 0x7a9   : > { %v1035_v54 = vpop.permute.xlu1 %1034 }
 0x7aa   : > { %v1040_v56 = vsel %vm552_vm2, %v1035_v54, 0 }
 0x7ad   : > { %v1033_v57 = vpop.permute.xlu1 %1032 }
 0x7b0   : > { %v1757_v52 = vpop.eup %1756 }
 0x7b1   : > { %v932_v53 = vmul.f32 %v1757_v52, %v1755_v42  ;;  %v1515_v52 = vld [vmem:[%s2229_s8] ss:$0 sm:$0xff] }
 0x7b3   : > { %v933_v55 = vpack.c.bf16 %v932_v53, %v932_v53 }
 0x7b5   : > { %1625 = vmatmul.mubr.msk.bf16.vlgmr.msra.gmra.mrb[8].mxu0 %vm552_vm2, %v933_v55 }
 0x7b6   : > { %1635 = vmatpush3.bf16.xpose.msra.mxu0 %v1040_v56  ;;  %1636 = vmatprep.mubr.msk.bf16.mxu0 %vm1831_vm1, %v1830_v8  ;;  %v1737_v56 = vld [vmem:[%s2232_s11 + $0x8] sm:$0xff]  }
 0x7b7   : > { %1646 = vmatprep.subr.bf16.mxu0 %v1830_v8 }
 0x7bd   : > { %1637 = vmatmul.mubr.msk.bf16.vlgmr.msra.gmra.mrb[12].mxu0 %vm552_vm2, %v1033_v57  ;;  %v1738_v57 = vld [vmem:[%s2232_s11 + $0x10] sm:$0xff]  }
 0x7be   : > { %1648 = vmatprep.mubr.msk.bf16.mxu0 %vm1831_vm1, %v1830_v8 }
 0x888   : > { %v976_v60 = vpop.f32.mrb[8].mxu0 }
 0x889   : > { %v982_v61 = vpack.c.bf16 %v976_v60, %v976_v60  ;;  %v1626_v62 = vpop.f32.mrb[9].mxu0  ;;  %v1741_v60 = vld [vmem:[%s2232_s11 + $0x28] sm:$0xff]  }
 0x88a   : > { %v979_v63 = vpop.f32.mrb[10].mxu0  ;;  %v1743_v62 = vld [vmem:[%s2232_s11 + $0x38] sm:$0xff]  }
 0x88b   : > { %v1627_v1 = vpop.f32.mrb[11].mxu0  ;;  %1631 = vmatmul.mubr.msk.bf16.vlgmr.msra.gmra.mrb[24].mxu1 %vm552_vm2, %v982_v61  ;;  %v1742_v61 = vld [vmem:[%s2232_s11 + $0x30] sm:$0xff]   ;;  %v1516_v63 = vld [vmem:[%s2231_s10] ss:$0 sm:$0xff] }
 0x88c   : > { %1642 = vmatprep.mubr.msk.bf16.mxu1 %vm1831_vm1, %v1830_v8 }
 0x890   : > { %v1076_v2 = vpop.f32.mrb[12].mxu0 }
 0x891   : > { %v1082_v3 = vsel %vm540_vm3, %v1076_v2, -inf  ;;  %v1638_v4 = vpop.f32.mrb[13].mxu0 }
 0x892   : > { %v1079_v5 = vpop.f32.mrb[14].mxu0  ;;  %v1083_v6 = vsel %vm552_vm2, %v1082_v3, -inf }
 0x893   : > { %1084 = vmax.xlane.f32.xlu0 %v1083_v6  ;;  %v1639_v7 = vpop.f32.mrb[15].mxu0 }
 0x8a9   : > { %1095 = vrot.lane.b32.xlu0 %v1999_v25, %s1842_s21  ;;  %v1150_v25 = vsel %vm617_vm4, %v1512_v14, 0  ;;  %v1520_v14 = vld [vmem:[%s2233_s12] ss:$0 sm:$0xff]  ;;  %s1770_s21 = sshll.u32 %s1843_s20, 4  ;;  %s1771_s21 = int_to_ptr.vmem [resolvable:$false] %s1770_s21 }
 0x8aa   : > { %1647 = vmatpush3.bf16.msra.mxu0 %v1150_v25  ;;  %s1772_s2 = scalar_lea.vmem %s1771_s21, 256  ;;  %p1773_p0 = scmp.lt.s32.totalorder %s2180_s24, %s1771_s21 }
 0x8ab   : > { %1660 = vmatprep.subr.bf16.mxu0 %v1830_v8  ;;  %p1774_p1 = scmp.lt.s32.totalorder %s1772_s2, %s1766_s16 }
 0x8ad   : > { %p1775_p2 = por %p1774_p1, %p1773_p0 }
 0x8af   : > { %p1776_p3 = pnand %p1775_p2, %p1769_p13 }
 0x920   : > { %v1085_v9 = vpop.xlane.xlu0 %1084 }
 0x921   : > { %v1086_v10 = vsub.f32 %v1082_v3, %v1085_v9 }
 0x923   : > { %v1087_v11 = vmul.f32 1.442695, %v1086_v10 }
 0x924   : > { %v1096_v12 = vpop.permute.xlu0 %1095 }
 0x925   : > { %1758 = vpow2.f32 %v1087_v11  ;;  %v1101_v13 = vsel %vm617_vm4, %v1096_v12, 0 }
 0x926   : > { %1641 = vmatpush3.bf16.msra.mxu1 %v1101_v13 }
 0x927   : > { %1652 = vmatprep.subr.bf16.mxu1 %v1830_v8 }
 0x92f   : > { %v1759_v33 = vpop.eup %1758 }
 0x930   : > { %v1089_v34 = vsel %vm552_vm2, %v1759_v33, 0.0 }
 0x931   : > { %1090 = vadd.xlane.f32.xlu1 %v1089_v34 }
 0x95e   : > { %v1025_v15 = vpop.f32.mrb[24].mxu1 }
 0x95f   : > { %v1031_v16 = vadd.f32 %v1025_v15, %v870_v47  ;;  %v1632_v17 = vpop.f32.mrb[25].mxu1 }
 0x960   : > { %v1028_v18 = vpop.f32.mrb[26].mxu1 }
 0x961   : > { %v1633_v19 = vpop.f32.mrb[27].mxu1 }
 0x9be   : > { %v1091_v20 = vpop.xlane.xlu1 %1090 }
 0x9bf   : > { %1760 = vrcp.f32 %v1091_v20 }
 0x9c9   : > { %v1761_v21 = vpop.eup %1760 }
 0x9ca   : > { %v1093_v22 = vmul.f32 %v1761_v21, %v1759_v33 }
 0x9cc   : > { %v1094_v23 = vpack.c.bf16 %v1093_v22, %v1093_v22 }
 0x9ce   : > { %1643 = vmatmul.mubr.msk.bf16.vlgmr.msra.gmra.mrb[28].mxu1 %vm552_vm2, %v1094_v23 }
 0x9cf   : > { %1656 = vmatprep.mubr.msk.bf16.mxu1 %vm1831_vm1, %v1830_v8  ;;  %1653 = vmatpush3.bf16.msra.mxu1 %v1734_v44 }
 0x9d0   : > { %1654 = vmatprep.subr.bf16.mxu1 %v1830_v8 }
 0xaa1   : > { %v1137_v24 = vpop.f32.mrb[28].mxu1 }
 0xaa2   : > { %v1143_v26 = vpack.c.bf16 %v1137_v24, %v1137_v24  ;;  %v1644_v27 = vpop.f32.mrb[29].mxu1 }
 0xaa3   : > { %v1140_v28 = vpop.f32.mrb[30].mxu1 }
 0xaa4   : > { %v1645_v29 = vpop.f32.mrb[31].mxu1  ;;  %1649 = vmatmul.mubr.msk.bf16.vlgmr.msra.gmra.mrb[16].mxu0 %vm552_vm2, %v1143_v26 }
 0xaa5   : > { %1676 = vmatprep.mubr.msk.bf16.mxu0 %vm1831_vm1, %v1830_v8  ;;  %1661 = vmatpush3.bf16.msra.mxu0 %v1736_v45 }
 0xaa6   : > { %1662 = vmatprep.subr.bf16.mxu0 %v1830_v8 }
 0xaa9   : > { %1663 = vmatpush3.bf16.msra.mxu0 %v1737_v56 }
 0xaaa   : > { %1664 = vmatprep.subr.bf16.mxu0 %v1830_v8 }
 0xaad   : > { %1665 = vmatpush3.bf16.msra.mxu0 %v1738_v57 }
 0xaae   : > { %1666 = vmatprep.subr.bf16.mxu0 %v1830_v8 }
 0xab1   : > { %1667 = vmatpush3.bf16.msra.mxu0 %v1739_v58 }
 0xab2   : > { %1668 = vmatprep.subr.bf16.mxu0 %v1830_v8 }
 0xab5   : > { %1669 = vmatpush3.bf16.msra.mxu0 %v1740_v59 }
 0xab6   : > { %1670 = vmatprep.subr.bf16.mxu0 %v1830_v8 }
 0xab9   : > { %1671 = vmatpush3.bf16.msra.mxu0 %v1741_v60 }
 0xaba   : > { %1672 = vmatprep.subr.bf16.mxu0 %v1830_v8 }
 0xabd   : > { %1673 = vmatpush3.bf16.msra.mxu0 %v1742_v61 }
 0xabe   : > { %1674 = vmatprep.subr.bf16.mxu0 %v1830_v8 }
 0xac1   : > { %1675 = vmatpush3.bf16.msra.mxu0 %v1743_v62 }
 0xb77   : > { %v1186_v30 = vpop.f32.mrb[16].mxu0 }
 0xb78   : > { %v1192_v31 = vadd.f32 %v1186_v30, %v1031_v16  ;;  %v1650_v32 = vpop.f32.mrb[17].mxu0 }
 0xb79   : > { %v1189_v35 = vpop.f32.mrb[18].mxu0 }
 0xb7a   : > { %v2115_v36 = vadd.f32 %v1192_v31, %v1967_v0  ;;  %v1651_v37 = vpop.f32.mrb[19].mxu0  ;;  %v1735_v0 = vld [vmem:[%s2230_s9 + $0x8] sm:$0xff]  }
 0xb7b   : > { %1655 = vmatpush3.bf16.msra.mxu1 %v1735_v0 }
 0xb7c   : > { %v1196_v38 = vsel %vm440_vm0, %v2115_v36, 0.0 }
 0xb7d   : > { %1197 = vadd.xlane.f32.xlu0 %v1196_v38 }
 0xc0a   : > { %v1198_v39 = vpop.xlane.xlu0 %1197 }
 0xc0b   : > { %v1199_v40 = vmul.f32 0.03125, %v1198_v39 }
 0xc0d   : > { %v1200_v41 = vsub.f32 %v2115_v36, %v1199_v40 }
 0xc0f   : > { %v1201_v42 = vmul.f32 %v1200_v41, %v1200_v41 }
 0xc11   : > { %v1202_v43 = vsel %vm440_vm0, %v1201_v42, 0.0 }
 0xc12   : > { %1203 = vadd.xlane.f32.xlu1 %v1202_v43 }
 0xc9f   : > { %v1204_v46 = vpop.xlane.xlu1 %1203 }
 0xca0   : > { %v1205_v47 = vmul.f32 0.03125, %v1204_v46 }
 0xca2   : > { %v1206_v48 = vadd.f32 1e-05, %v1205_v47 }
 0xca4   : > { %1762 = vrsqrt.f32 %v1206_v48 }
 0xcae   : > { %v1763_v49 = vpop.eup %1762 }
 0xcaf   : > { %v1208_v51 = vmul.f32 %v1763_v49, %v1200_v41 }
 0xcb1   : > { %v1215_v53 = vmul.f32 %v1514_v50, %v1208_v51 }
 0xcb3   : > { %v1222_v54 = vadd.f32 %v1515_v52, %v1215_v53 }
 0xcb5   : > { %v1223_v55 = vpack.c.bf16 %v1222_v54, %v1222_v54 }
 0xcb7   : > { %1657 = vmatmul.mubr.msk.bf16.vlgmr.msra.gmra.mrb[32].mxu1 %vm440_vm0, %v1223_v55 }
 0xd8a   : > { %v1284_v1 = vpop.f32.mrb[32].mxu1 }
 0xd8b   : > { %v1285_v2 = vadd.f32 %v1516_v63, %v1284_v1  ;;  %v1658_v3 = vpop.f32.mrb[33].mxu1 }
 0xd8c   : > { %v1287_v4 = vpop.f32.mrb[34].mxu1 }
 0xd8d   : > { %v1291_v5 = vmul.f32 0.044715, %v1285_v2  ;;  %v1659_v6 = vpop.f32.mrb[35].mxu1  ;;  %v1290_v8 = vmul.f32 0.5, %v1285_v2 }
 0xd8f   : > { %v1292_v7 = vmul.f32 %v1291_v5, %v1285_v2 }
 0xd91   : > { %v1293_v9 = vmul.f32 %v1292_v7, %v1285_v2 }
 0xd93   : > { %v1294_v10 = vadd.f32 %v1293_v9, %v1285_v2 }
 0xd95   : > { %v1295_v11 = vmul.f32 0.7978846, %v1294_v10 }
 0xd97   : > { %1764 = vtanh.f32 %v1295_v11 }
 0xda1   : > { %v1765_v12 = vpop.eup %1764 }
 0xda2   : > { %v1297_v13 = vadd.f32 1.0, %v1765_v12 }
 0xda4   : > { %v1298_v33 = vmul.f32 %v1297_v13, %v1290_v8 }
 0xda6   : > { %v1299_v34 = vpack.c.bf16 %v1298_v33, %v1298_v33 }
 0xda8   : > { %1677 = vmatmul.mubr.bf16.vlgmr.msra.gmra.mrb[20].mxu0 %v1299_v34 }
 0xe7b   : > { %v1405_v25 = vpop.f32.mrb[20].mxu0 }
 0xe7c   : > { %v1406_v15 = vadd.f32 %v1520_v14, %v1405_v25  ;;  %v1678_v16 = vpop.f32.mrb[21].mxu0 }
 0xe7d   : > { %v1408_v17 = vpop.f32.mrb[22].mxu0 }
 0xe7e   : > { %v1411_v18 = vadd.f32 %v1406_v15, %v2115_v36  ;;  %v1679_v19 = vpop.f32.mrb[23].mxu0 }
 0xe80   : > { %1412 = vst.msk [vmem:[%s431_s23] sm:$0xff] %vm440_vm0, %v1411_v18 }
 0xe81   : > { %1779 = shalt.err (!%p1776_p3)
}
 0xe82   : > { %s1780_s0 = scalar_lea.hbm %s2178_s1, 128  ;;  %s1784_s23 = scalar_lea.hbm %s2234_s13, 256 }
 0xe83   : > { %p1781_p4 = scmp.ne.s32.totalorder %s2178_s1, %s1780_s0  ;;  %p1785_p9 = scmp.lt.u32.totalorder %s2178_s1, %s2234_s13 }
 0xe84   : > { %p1786_p10 = scmp.lt.u32.totalorder %s1784_s23, %s1780_s0  ;;  %p1788_p12 = scmp.lt.u32.totalorder %s1780_s0, %s2178_s1 }
 0xe85   : > { %p1782_p7 = pnand %p1781_p4, %p1952_p5 }
 0xe86   : > { %p1787_p11 = por %p1786_p10, %p1785_p9 }
 0xe87   : > { %p1783_p8 = pneg %p1782_p7 }
 0xe88   : > { %p1789_p13 = por %p1788_p12, %p1787_p11 }
 0xe8a   : > { %p1790_p0 = pnand %p1789_p13, %p1783_p8 }
 0xe8c   : > { %1793 = shalt.err (!%p1790_p0)
}
 0xe8d   : > { %1680 = dma.vmem_to_hbm [thread:$0]  (%p1952_p5), %s2180_s24, 128, %s2178_s1, %s1414_s29  }
 0xe8e PF: > { %p1686_p1 = scmp.ge.s32.totalorder %s1828_s28, 2  ;;  %s1439_s2 = sand.u32 1, %s1816_s25  }
 0xe8f   : > { %s1440_s16 = scalar_lea.sflag [#allocation3], %s1439_s2 }
 0xe90   : > { %p1683_p2 = pnand %p1686_p1, %p1956_p6 }
 0xe92   : > { %1811 = dma.done.wait (!%p1683_p2), %s1440_s16, 128  }
 0xe93   : > { %1813 = vsyncadd (!%p1683_p2), %s1440_s16, 4294967168  ;;  %p23_p3 = scmp.ge.s32.totalorder %s1939_s14, 4   ;;  %s2243_s25 = smov %s1820_s26 }
 0xe94   : > { %s2244_s26 = smov %s1824_s27  ;;  %s2245_s27 = smov %s1950_s17 }
 0xe95   : > { %s2246_s28 = smov %s1939_s14  ;;  %25 = sbr.rel (!%p23_p3) target bundleno = 7 (0x7), region = 110 }
 0xe9c   :  { %1445 = vsyncpa [#allocation3], 1 }
 0xe9d   :  { %1447 = vsyncpa [#allocation3 + $0x1], 1 }

</bundles_post_ra>
